<compile_context>
chip_gen: v7x
topology: tpu7x:2x2x1
jax: 0.10.0
libtpu: 0.0.40
codegen_flags: <defaults>
</compile_context>

<pallas_src>
import jax
import jax.numpy as jnp
import numpy as np
from jax.experimental import pallas as pl
from jax.experimental.pallas import tpu as pltpu


def _round_up(x, m):
    return ((x + m - 1) // m) * m


def _pad_gates_last(a, h, h_pad, n_gates=4):
    """(..., n_gates*h) -> (..., n_gates*h_pad), each gate block zero-padded to h_pad lanes."""
    lead = a.shape[:-1]
    a4 = a.reshape(*lead, n_gates, h)
    a4 = jnp.pad(a4, [(0, 0)] * len(lead) + [(0, 0), (0, h_pad - h)])
    return a4.reshape(*lead, n_gates * h_pad)


def _make_recurrence_kernel(t_total, t_chunk):
    """Serial ContextLSTM recurrence over a chunk of t_chunk timesteps per grid step."""
    mask_needed = (t_total % t_chunk) != 0

    def kernel(gx_ref, wh_ref, h_out_ref, h_sc, c_sc):
        g = pl.program_id(0)
        hp = h_sc.shape[1]

        # init h/c state once, at the first chunk
        @pl.when(g == 0)
        def _():
            h_sc[...] = jnp.zeros_like(h_sc)
            c_sc[...] = jnp.zeros_like(c_sc)

        wh = wh_ref[...]  # (Hp, 4*Hp), resident for all chunks (constant block index)

        def step(i, carry):
            h, c = carry
            # gates_x already folds x@Wi + ctx@Wc + all biases (hoisted in wrapper)
            gates = gx_ref[i] + jnp.dot(h, wh, preferred_element_type=jnp.float32)
            # Hp is a multiple of 128 -> every gate slice is lane-aligned (pure VPU/EUP)
            i_g = jax.nn.sigmoid(gates[:, 0 * hp:1 * hp])
            f_g = jax.nn.sigmoid(gates[:, 1 * hp:2 * hp])
            g_g = jnp.tanh(gates[:, 2 * hp:3 * hp])
            o_g = jax.nn.sigmoid(gates[:, 3 * hp:4 * hp])
            c_new = f_g * c + i_g * g_g
            h_new = o_g * jnp.tanh(c_new)
            if mask_needed:  # only when T does not divide the chunk (tail padding)
                valid = (g * t_chunk + i) < t_total
                h_new = jnp.where(valid, h_new, h)
                c_new = jnp.where(valid, c_new, c)
            return h_new, c_new

        h, c = jax.lax.fori_loop(0, t_chunk, step, (h_sc[...], c_sc[...]), unroll=True)
        h_sc[...] = h
        c_sc[...] = c
        # constant output block index -> stays resident; final chunk's value is written back
        h_out_ref[...] = h

    return kernel


def decoder_lstm_forward(v_features, i_features, params, *, time_chunk=32):
    """v_features: (B, ctx_hidden), i_features: (B, T, input_size) -> (B, num_classes)."""
    f32 = jnp.float32
    B, T, Din = i_features.shape
    H = params["wh"].shape[0]          # hidden_size (wh: (H, 4H))

    # ---- padded / aligned layout ----
    Hp = _round_up(H, 128)             # lane-aligned gate width
    Bp = _round_up(max(B, 8), 8)       # at least one full sublane group
    Tc = min(time_chunk, T)            # timesteps per grid step
    Tp = Tc * pl.cdiv(T, Tc)

    # gate-blocked, zero-padded weights (zeros keep padded h/c lanes exactly 0)
    wi_p = _pad_gates_last(params["wi"].astype(f32), H, Hp)                 # (Din, 4Hp)
    wc_p = _pad_gates_last(params["wc"].astype(f32), H, Hp)                 # (Cctx, 4Hp)
    b_p = _pad_gates_last(
        (params["bi"] + params["bh"] + params["bc"]).astype(f32), H, Hp)    # (1, 4Hp)
    wh_p = _pad_gates_last(params["wh"].astype(f32), H, Hp)                 # (H, 4Hp)
    wh_p = jnp.pad(wh_p, ((0, Hp - H), (0, 0)))                             # (Hp, 4Hp)

    # ---- prologue (hoisted out of the serial loop): one batched matmul ----
    x = i_features.astype(f32).reshape(B * T, Din)
    gx = jnp.dot(x, wi_p, preferred_element_type=f32).reshape(B, T, 4 * Hp)
    ctx_g = jnp.dot(v_features.astype(f32), wc_p, preferred_element_type=f32) + b_p
    gx = gx + ctx_g[:, None, :]                                             # (B, T, 4Hp)
    gx = jnp.pad(gx, ((0, Bp - B), (0, Tp - T), (0, 0)))
    gx = jnp.transpose(gx, (1, 0, 2))                                       # (Tp, Bp, 4Hp)

    # ---- VMEM budget (explicit, per v7x 64 MiB note) ----
    gx_block_bytes = Tc * Bp * 4 * Hp * 4
    wh_bytes = Hp * 4 * Hp * 4
    state_bytes = Bp * Hp * 4
    vmem_needed = 2 * gx_block_bytes + 2 * wh_bytes + 4 * state_bytes
    vmem_limit = int(min(max(2 * vmem_needed, 16 * 2 ** 20), 64 * 2 ** 20))

    h_last_padded = pl.pallas_call(
        _make_recurrence_kernel(T, Tc),
        out_shape=jax.ShapeDtypeStruct((Bp, Hp), f32),
        grid_spec=pltpu.PrefetchScalarGridSpec(
            num_scalar_prefetch=0,
            grid=(Tp // Tc,),
            in_specs=[
                pl.BlockSpec((Tc, Bp, 4 * Hp), lambda g: (g, 0, 0)),   # gates_x chunk
                pl.BlockSpec((Hp, 4 * Hp), lambda g: (0, 0)),          # Wh (resident)
            ],
            out_specs=pl.BlockSpec((Bp, Hp), lambda g: (0, 0)),
            scratch_shapes=[
                pltpu.VMEM((Bp, Hp), f32),    # h state
                pltpu.VMEM((Bp, Hp), f32),    # c state
            ],
        ),
        compiler_params=pltpu.CompilerParams(
            dimension_semantics=("arbitrary",),   # time axis is serial
            vmem_limit_bytes=vmem_limit,
        ),
    )(gx, wh_p)

    # ---- epilogue (one-shot head, kept out of the recurrent kernel) ----
    h_last = h_last_padded[:B, :H]
    y = jnp.maximum(jnp.dot(h_last, params["wadd"]) + params["badd"], 0.0)
    # dropout(p=0.5) = identity in eval mode
    return jnp.dot(y, params["wfc"]) + params["bfc"]


def _init_params(key, input_size, hidden_size, ctx_hidden_size, fc_hidden_size, num_classes):
    """Deterministic synthetic weights (PyTorch-Linear-style uniform init), stored as (in, out)."""
    def linear(k, fan_in, fan_out):
        k1, k2 = jax.random.split(k)
        bound = 1.0 / np.sqrt(fan_in)
        w = jax.random.uniform(k1, (fan_in, fan_out), jnp.float32, -bound, bound)
        b = jax.random.uniform(k2, (1, fan_out), jnp.float32, -bound, bound)
        return w, b

    ks = jax.random.split(key, 5)
    wi, bi = linear(ks[0], input_size, 4 * hidden_size)
    wh, bh = linear(ks[1], hidden_size, 4 * hidden_size)
    wc, bc = linear(ks[2], ctx_hidden_size, 4 * hidden_size)
    wadd, badd = linear(ks[3], hidden_size, fc_hidden_size)
    wfc, bfc = linear(ks[4], fc_hidden_size, num_classes)
    return dict(wi=wi, bi=bi, wh=wh, bh=bh, wc=wc, bc=bc,
                wadd=wadd, badd=badd, wfc=wfc, bfc=bfc)


def _reference_forward(v_features, i_features, p):
    """Pure-JAX reference of DecoderLSTM.forward (eval mode: dropout = identity)."""
    B, T, _ = i_features.shape
    H = p["wh"].shape[0]
    ctx_gates = v_features @ p["wc"] + p["bc"] + p["bi"] + p["bh"]

    def step(carry, x_t):
        h, c = carry
        gates = x_t @ p["wi"] + h @ p["wh"] + ctx_gates
        i_g = jax.nn.sigmoid(gates[:, 0 * H:1 * H])
        f_g = jax.nn.sigmoid(gates[:, 1 * H:2 * H])
        g_g = jnp.tanh(gates[:, 2 * H:3 * H])
        o_g = jax.nn.sigmoid(gates[:, 3 * H:4 * H])
        c_new = f_g * c + i_g * g_g
        h_new = o_g * jnp.tanh(c_new)
        return (h_new, c_new), h_new

    h0 = jnp.zeros((B, H), jnp.float32)
    (h_last, _), _ = jax.lax.scan(step, (h0, h0), jnp.transpose(i_features, (1, 0, 2)))
    y = jnp.maximum(h_last @ p["wadd"] + p["badd"], 0.0)
    return y @ p["wfc"] + p["bfc"]


if __name__ == "__main__":
    # small shapes implied by the module
    B, T = 2, 8
    input_size = 16
    hidden_size = 32
    ctx_hidden_size = 24
    fc_hidden_size = 20
    num_classes = 7

    key = jax.random.PRNGKey(0)
    k_v, k_i, k_p = jax.random.split(key, 3)
    v_features = jax.random.normal(k_v, (B, ctx_hidden_size), jnp.float32)
    i_features = jax.random.normal(k_i, (B, T, input_size), jnp.float32)
    params = _init_params(k_p, input_size, hidden_size, ctx_hidden_size,
                          fc_hidden_size, num_classes)

    out = decoder_lstm_forward(v_features, i_features, params)
    out = jax.block_until_ready(out)

    ref = jax.block_until_ready(_reference_forward(v_features, i_features, params))
    np.testing.assert_allclose(np.asarray(out), np.asarray(ref), rtol=1e-4, atol=1e-4)

    print("KERNEL_OK")
</pallas_src>

<mosaic_0001>
module attributes {stable_mosaic.version = 11 : i64} {
  func.func @kernel(%arg0: i32, %arg1: memref<8x8x512xf32, #tpu.memory_space<vmem>>, %arg2: memref<128x512xf32, #tpu.memory_space<vmem>>, %arg3: memref<8x128xf32, #tpu.memory_space<vmem>>, %arg4: memref<8x128xf32, #tpu.memory_space<vmem>>, %arg5: memref<8x128xf32, #tpu.memory_space<vmem>>) attributes {dimension_semantics = [#tpu.dimension_semantics<arbitrary>], iteration_bounds = array<i64: 1>, scalar_prefetch = 0 : i64, scratch_operands = 2 : i64, tpu.core_type = #tpu.core_type<tc>, window_params = [{transform_indices = @transform_0, window_bounds = array<i64: 8, 8, 512>}, {pipeline_mode = #tpu.pipeline_mode<synchronous>, transform_indices = @transform_1, window_bounds = array<i64: 128, 512>}, {pipeline_mode = #tpu.pipeline_mode<synchronous>, transform_indices = @transform_2, window_bounds = array<i64: 8, 128>}]} {
    %c0_i32 = arith.constant 0 : i32
    %0 = arith.cmpi eq, %arg0, %c0_i32 : i32
    %1 = arith.extui %0 : i1 to i32
    %c0_i32_0 = arith.constant 0 : i32
    %2 = arith.cmpi ne, %1, %c0_i32_0 : i32
    scf.if %2 {
      %cst_60 = arith.constant 0.000000e+00 : f32
      %249 = vector.broadcast %cst_60 : f32 to vector<8x128xf32>
      %c0_61 = arith.constant 0 : index
      %c0_62 = arith.constant 0 : index
      %250 = vector.load %arg4[%c0_61, %c0_62] : memref<8x128xf32, #tpu.memory_space<vmem>>, vector<8x128xf32>
      tpu.vector_store %arg4[%c0_61, %c0_62], %249 {strides = array<i32>} : memref<8x128xf32, #tpu.memory_space<vmem>>, vector<8x128xf32>,
      %cst_63 = arith.constant 0.000000e+00 : f32
      %251 = vector.broadcast %cst_63 : f32 to vector<8x128xf32>
      %c0_64 = arith.constant 0 : index
      %c0_65 = arith.constant 0 : index
      %252 = vector.load %arg5[%c0_64, %c0_65] : memref<8x128xf32, #tpu.memory_space<vmem>>, vector<8x128xf32>
      tpu.vector_store %arg5[%c0_64, %c0_65], %251 {strides = array<i32>} : memref<8x128xf32, #tpu.memory_space<vmem>>, vector<8x128xf32>,
    } else {
    }
    %c0 = arith.constant 0 : index
    %c0_1 = arith.constant 0 : index
    %3 = vector.load %arg2[%c0, %c0_1] : memref<128x512xf32, #tpu.memory_space<vmem>>, vector<128x512xf32>
    %c0_2 = arith.constant 0 : index
    %c0_3 = arith.constant 0 : index
    %4 = vector.load %arg4[%c0_2, %c0_3] : memref<8x128xf32, #tpu.memory_space<vmem>>, vector<8x128xf32>
    %c0_4 = arith.constant 0 : index
    %c0_5 = arith.constant 0 : index
    %5 = vector.load %arg5[%c0_4, %c0_5] : memref<8x128xf32, #tpu.memory_space<vmem>>, vector<8x128xf32>
    %c0_i32_6 = arith.constant 0 : i32
    %6 = arith.index_cast %c0_i32_6 : i32 to index
    %c0_7 = arith.constant 0 : index
    %c0_8 = arith.constant 0 : index
    %7 = vector.load %arg1[%6, %c0_7, %c0_8] : memref<8x8x512xf32, #tpu.memory_space<vmem>>, vector<1x8x512xf32>
    %8 = vector.shape_cast %7 : vector<1x8x512xf32> to vector<8x512xf32>
    %cst = arith.constant dense<0.000000e+00> : vector<8x512xf32>
    %9 = tpu.matmul %4, %3, %cst {dimension_numbers = #tpu.dot_dimension_numbers<[1], [0], [0], [1], [0, 0, 1, 1], [], []>} : vector<8x128xf32>, vector<128x512xf32>, vector<8x512xf32> -> vector<8x512xf32>
    %10 = arith.addf %8, %9 : vector<8x512xf32>
    %11 = vector.extract_strided_slice %10 {offsets = [0, 0], sizes = [8, 128], strides = [1, 1]} : vector<8x512xf32> to vector<8x128xf32>
    %12 = arith.negf %11 : vector<8x128xf32>
    %13 = math.exp %12 : vector<8x128xf32>
    %cst_9 = arith.constant 1.000000e+00 : f32
    %14 = vector.broadcast %cst_9 : f32 to vector<8x128xf32>
    %15 = arith.addf %14, %13 : vector<8x128xf32>
    %16 = arith.divf %14, %15 : vector<8x128xf32>
    %17 = vector.extract_strided_slice %10 {offsets = [0, 128], sizes = [8, 128], strides = [1, 1]} : vector<8x512xf32> to vector<8x128xf32>
    %18 = arith.negf %17 : vector<8x128xf32>
    %19 = math.exp %18 : vector<8x128xf32>
    %cst_10 = arith.constant 1.000000e+00 : f32
    %20 = vector.broadcast %cst_10 : f32 to vector<8x128xf32>
    %21 = arith.addf %20, %19 : vector<8x128xf32>
    %22 = arith.divf %20, %21 : vector<8x128xf32>
    %23 = vector.extract_strided_slice %10 {offsets = [0, 256], sizes = [8, 128], strides = [1, 1]} : vector<8x512xf32> to vector<8x128xf32>
    %24 = math.tanh %23 : vector<8x128xf32>
    %25 = vector.extract_strided_slice %10 {offsets = [0, 384], sizes = [8, 128], strides = [1, 1]} : vector<8x512xf32> to vector<8x128xf32>
    %26 = arith.negf %25 : vector<8x128xf32>
    %27 = math.exp %26 : vector<8x128xf32>
    %cst_11 = arith.constant 1.000000e+00 : f32
    %28 = vector.broadcast %cst_11 : f32 to vector<8x128xf32>
    %29 = arith.addf %28, %27 : vector<8x128xf32>
    %30 = arith.divf %28, %29 : vector<8x128xf32>
    %31 = arith.mulf %22, %5 : vector<8x128xf32>
    %32 = arith.mulf %16, %24 : vector<8x128xf32>
    %33 = arith.addf %31, %32 : vector<8x128xf32>
    %34 = math.tanh %33 : vector<8x128xf32>
    %35 = arith.mulf %30, %34 : vector<8x128xf32>
    %c1_i32 = arith.constant 1 : i32
    %36 = arith.index_cast %c1_i32 : i32 to index
    %c0_12 = arith.constant 0 : index
    %c0_13 = arith.constant 0 : index
    %37 = vector.load %arg1[%36, %c0_12, %c0_13] : memref<8x8x512xf32, #tpu.memory_space<vmem>>, vector<1x8x512xf32>
    %38 = vector.shape_cast %37 : vector<1x8x512xf32> to vector<8x512xf32>
    %cst_14 = arith.constant dense<0.000000e+00> : vector<8x512xf32>
    %39 = tpu.matmul %35, %3, %cst_14 {dimension_numbers = #tpu.dot_dimension_numbers<[1], [0], [0], [1], [0, 0, 1, 1], [], []>} : vector<8x128xf32>, vector<128x512xf32>, vector<8x512xf32> -> vector<8x512xf32>
    %40 = arith.addf %38, %39 : vector<8x512xf32>
    %41 = vector.extract_strided_slice %40 {offsets = [0, 0], sizes = [8, 128], strides = [1, 1]} : vector<8x512xf32> to vector<8x128xf32>
    %42 = arith.negf %41 : vector<8x128xf32>
    %43 = math.exp %42 : vector<8x128xf32>
    %cst_15 = arith.constant 1.000000e+00 : f32
    %44 = vector.broadcast %cst_15 : f32 to vector<8x128xf32>
    %45 = arith.addf %44, %43 : vector<8x128xf32>
    %46 = arith.divf %44, %45 : vector<8x128xf32>
    %47 = vector.extract_strided_slice %40 {offsets = [0, 128], sizes = [8, 128], strides = [1, 1]} : vector<8x512xf32> to vector<8x128xf32>
    %48 = arith.negf %47 : vector<8x128xf32>
    %49 = math.exp %48 : vector<8x128xf32>
    %cst_16 = arith.constant 1.000000e+00 : f32
    %50 = vector.broadcast %cst_16 : f32 to vector<8x128xf32>
    %51 = arith.addf %50, %49 : vector<8x128xf32>
    %52 = arith.divf %50, %51 : vector<8x128xf32>
    %53 = vector.extract_strided_slice %40 {offsets = [0, 256], sizes = [8, 128], strides = [1, 1]} : vector<8x512xf32> to vector<8x128xf32>
    %54 = math.tanh %53 : vector<8x128xf32>
    %55 = vector.extract_strided_slice %40 {offsets = [0, 384], sizes = [8, 128], strides = [1, 1]} : vector<8x512xf32> to vector<8x128xf32>
    %56 = arith.negf %55 : vector<8x128xf32>
    %57 = math.exp %56 : vector<8x128xf32>
    %cst_17 = arith.constant 1.000000e+00 : f32
    %58 = vector.broadcast %cst_17 : f32 to vector<8x128xf32>
    %59 = arith.addf %58, %57 : vector<8x128xf32>
    %60 = arith.divf %58, %59 : vector<8x128xf32>
    %61 = arith.mulf %52, %33 : vector<8x128xf32>
    %62 = arith.mulf %46, %54 : vector<8x128xf32>
    %63 = arith.addf %61, %62 : vector<8x128xf32>
    %64 = math.tanh %63 : vector<8x128xf32>
    %65 = arith.mulf %60, %64 : vector<8x128xf32>
    %c2_i32 = arith.constant 2 : i32
    %66 = arith.index_cast %c2_i32 : i32 to index
    %c0_18 = arith.constant 0 : index
    %c0_19 = arith.constant 0 : index
    %67 = vector.load %arg1[%66, %c0_18, %c0_19] : memref<8x8x512xf32, #tpu.memory_space<vmem>>, vector<1x8x512xf32>
    %68 = vector.shape_cast %67 : vector<1x8x512xf32> to vector<8x512xf32>
    %cst_20 = arith.constant dense<0.000000e+00> : vector<8x512xf32>
    %69 = tpu.matmul %65, %3, %cst_20 {dimension_numbers = #tpu.dot_dimension_numbers<[1], [0], [0], [1], [0, 0, 1, 1], [], []>} : vector<8x128xf32>, vector<128x512xf32>, vector<8x512xf32> -> vector<8x512xf32>
    %70 = arith.addf %68, %69 : vector<8x512xf32>
    %71 = vector.extract_strided_slice %70 {offsets = [0, 0], sizes = [8, 128], strides = [1, 1]} : vector<8x512xf32> to vector<8x128xf32>
    %72 = arith.negf %71 : vector<8x128xf32>
    %73 = math.exp %72 : vector<8x128xf32>
    %cst_21 = arith.constant 1.000000e+00 : f32
    %74 = vector.broadcast %cst_21 : f32 to vector<8x128xf32>
    %75 = arith.addf %74, %73 : vector<8x128xf32>
    %76 = arith.divf %74, %75 : vector<8x128xf32>
    %77 = vector.extract_strided_slice %70 {offsets = [0, 128], sizes = [8, 128], strides = [1, 1]} : vector<8x512xf32> to vector<8x128xf32>
    %78 = arith.negf %77 : vector<8x128xf32>
    %79 = math.exp %78 : vector<8x128xf32>
    %cst_22 = arith.constant 1.000000e+00 : f32
    %80 = vector.broadcast %cst_22 : f32 to vector<8x128xf32>
    %81 = arith.addf %80, %79 : vector<8x128xf32>
    %82 = arith.divf %80, %81 : vector<8x128xf32>
    %83 = vector.extract_strided_slice %70 {offsets = [0, 256], sizes = [8, 128], strides = [1, 1]} : vector<8x512xf32> to vector<8x128xf32>
    %84 = math.tanh %83 : vector<8x128xf32>
    %85 = vector.extract_strided_slice %70 {offsets = [0, 384], sizes = [8, 128], strides = [1, 1]} : vector<8x512xf32> to vector<8x128xf32>
    %86 = arith.negf %85 : vector<8x128xf32>
    %87 = math.exp %86 : vector<8x128xf32>
    %cst_23 = arith.constant 1.000000e+00 : f32
    %88 = vector.broadcast %cst_23 : f32 to vector<8x128xf32>
    %89 = arith.addf %88, %87 : vector<8x128xf32>
    %90 = arith.divf %88, %89 : vector<8x128xf32>
    %91 = arith.mulf %82, %63 : vector<8x128xf32>
    %92 = arith.mulf %76, %84 : vector<8x128xf32>
    %93 = arith.addf %91, %92 : vector<8x128xf32>
    %94 = math.tanh %93 : vector<8x128xf32>
    %95 = arith.mulf %90, %94 : vector<8x128xf32>
    %c3_i32 = arith.constant 3 : i32
    %96 = arith.index_cast %c3_i32 : i32 to index
    %c0_24 = arith.constant 0 : index
    %c0_25 = arith.constant 0 : index
    %97 = vector.load %arg1[%96, %c0_24, %c0_25] : memref<8x8x512xf32, #tpu.memory_space<vmem>>, vector<1x8x512xf32>
    %98 = vector.shape_cast %97 : vector<1x8x512xf32> to vector<8x512xf32>
    %cst_26 = arith.constant dense<0.000000e+00> : vector<8x512xf32>
    %99 = tpu.matmul %95, %3, %cst_26 {dimension_numbers = #tpu.dot_dimension_numbers<[1], [0], [0], [1], [0, 0, 1, 1], [], []>} : vector<8x128xf32>, vector<128x512xf32>, vector<8x512xf32> -> vector<8x512xf32>
    %100 = arith.addf %98, %99 : vector<8x512xf32>
    %101 = vector.extract_strided_slice %100 {offsets = [0, 0], sizes = [8, 128], strides = [1, 1]} : vector<8x512xf32> to vector<8x128xf32>
    %102 = arith.negf %101 : vector<8x128xf32>
    %103 = math.exp %102 : vector<8x128xf32>
    %cst_27 = arith.constant 1.000000e+00 : f32
    %104 = vector.broadcast %cst_27 : f32 to vector<8x128xf32>
    %105 = arith.addf %104, %103 : vector<8x128xf32>
    %106 = arith.divf %104, %105 : vector<8x128xf32>
    %107 = vector.extract_strided_slice %100 {offsets = [0, 128], sizes = [8, 128], strides = [1, 1]} : vector<8x512xf32> to vector<8x128xf32>
    %108 = arith.negf %107 : vector<8x128xf32>
    %109 = math.exp %108 : vector<8x128xf32>
    %cst_28 = arith.constant 1.000000e+00 : f32
    %110 = vector.broadcast %cst_28 : f32 to vector<8x128xf32>
    %111 = arith.addf %110, %109 : vector<8x128xf32>
    %112 = arith.divf %110, %111 : vector<8x128xf32>
    %113 = vector.extract_strided_slice %100 {offsets = [0, 256], sizes = [8, 128], strides = [1, 1]} : vector<8x512xf32> to vector<8x128xf32>
    %114 = math.tanh %113 : vector<8x128xf32>
    %115 = vector.extract_strided_slice %100 {offsets = [0, 384], sizes = [8, 128], strides = [1, 1]} : vector<8x512xf32> to vector<8x128xf32>
    %116 = arith.negf %115 : vector<8x128xf32>
    %117 = math.exp %116 : vector<8x128xf32>
    %cst_29 = arith.constant 1.000000e+00 : f32
    %118 = vector.broadcast %cst_29 : f32 to vector<8x128xf32>
    %119 = arith.addf %118, %117 : vector<8x128xf32>
    %120 = arith.divf %118, %119 : vector<8x128xf32>
    %121 = arith.mulf %112, %93 : vector<8x128xf32>
    %122 = arith.mulf %106, %114 : vector<8x128xf32>
    %123 = arith.addf %121, %122 : vector<8x128xf32>
    %124 = math.tanh %123 : vector<8x128xf32>
    %125 = arith.mulf %120, %124 : vector<8x128xf32>
    %c4_i32 = arith.constant 4 : i32
    %126 = arith.index_cast %c4_i32 : i32 to index
    %c0_30 = arith.constant 0 : index
    %c0_31 = arith.constant 0 : index
    %127 = vector.load %arg1[%126, %c0_30, %c0_31] : memref<8x8x512xf32, #tpu.memory_space<vmem>>, vector<1x8x512xf32>
    %128 = vector.shape_cast %127 : vector<1x8x512xf32> to vector<8x512xf32>
    %cst_32 = arith.constant dense<0.000000e+00> : vector<8x512xf32>
    %129 = tpu.matmul %125, %3, %cst_32 {dimension_numbers = #tpu.dot_dimension_numbers<[1], [0], [0], [1], [0, 0, 1, 1], [], []>} : vector<8x128xf32>, vector<128x512xf32>, vector<8x512xf32> -> vector<8x512xf32>
    %130 = arith.addf %128, %129 : vector<8x512xf32>
    %131 = vector.extract_strided_slice %130 {offsets = [0, 0], sizes = [8, 128], strides = [1, 1]} : vector<8x512xf32> to vector<8x128xf32>
    %132 = arith.negf %131 : vector<8x128xf32>
    %133 = math.exp %132 : vector<8x128xf32>
    %cst_33 = arith.constant 1.000000e+00 : f32
    %134 = vector.broadcast %cst_33 : f32 to vector<8x128xf32>
    %135 = arith.addf %134, %133 : vector<8x128xf32>
    %136 = arith.divf %134, %135 : vector<8x128xf32>
    %137 = vector.extract_strided_slice %130 {offsets = [0, 128], sizes = [8, 128], strides = [1, 1]} : vector<8x512xf32> to vector<8x128xf32>
    %138 = arith.negf %137 : vector<8x128xf32>
    %139 = math.exp %138 : vector<8x128xf32>
    %cst_34 = arith.constant 1.000000e+00 : f32
    %140 = vector.broadcast %cst_34 : f32 to vector<8x128xf32>
    %141 = arith.addf %140, %139 : vector<8x128xf32>
    %142 = arith.divf %140, %141 : vector<8x128xf32>
    %143 = vector.extract_strided_slice %130 {offsets = [0, 256], sizes = [8, 128], strides = [1, 1]} : vector<8x512xf32> to vector<8x128xf32>
    %144 = math.tanh %143 : vector<8x128xf32>
    %145 = vector.extract_strided_slice %130 {offsets = [0, 384], sizes = [8, 128], strides = [1, 1]} : vector<8x512xf32> to vector<8x128xf32>
    %146 = arith.negf %145 : vector<8x128xf32>
    %147 = math.exp %146 : vector<8x128xf32>
    %cst_35 = arith.constant 1.000000e+00 : f32
    %148 = vector.broadcast %cst_35 : f32 to vector<8x128xf32>
    %149 = arith.addf %148, %147 : vector<8x128xf32>
    %150 = arith.divf %148, %149 : vector<8x128xf32>
    %151 = arith.mulf %142, %123 : vector<8x128xf32>
    %152 = arith.mulf %136, %144 : vector<8x128xf32>
    %153 = arith.addf %151, %152 : vector<8x128xf32>
    %154 = math.tanh %153 : vector<8x128xf32>
    %155 = arith.mulf %150, %154 : vector<8x128xf32>
    %c5_i32 = arith.constant 5 : i32
    %156 = arith.index_cast %c5_i32 : i32 to index
    %c0_36 = arith.constant 0 : index
    %c0_37 = arith.constant 0 : index
    %157 = vector.load %arg1[%156, %c0_36, %c0_37] : memref<8x8x512xf32, #tpu.memory_space<vmem>>, vector<1x8x512xf32>
    %158 = vector.shape_cast %157 : vector<1x8x512xf32> to vector<8x512xf32>
    %cst_38 = arith.constant dense<0.000000e+00> : vector<8x512xf32>
    %159 = tpu.matmul %155, %3, %cst_38 {dimension_numbers = #tpu.dot_dimension_numbers<[1], [0], [0], [1], [0, 0, 1, 1], [], []>} : vector<8x128xf32>, vector<128x512xf32>, vector<8x512xf32> -> vector<8x512xf32>
    %160 = arith.addf %158, %159 : vector<8x512xf32>
    %161 = vector.extract_strided_slice %160 {offsets = [0, 0], sizes = [8, 128], strides = [1, 1]} : vector<8x512xf32> to vector<8x128xf32>
    %162 = arith.negf %161 : vector<8x128xf32>
    %163 = math.exp %162 : vector<8x128xf32>
    %cst_39 = arith.constant 1.000000e+00 : f32
    %164 = vector.broadcast %cst_39 : f32 to vector<8x128xf32>
    %165 = arith.addf %164, %163 : vector<8x128xf32>
    %166 = arith.divf %164, %165 : vector<8x128xf32>
    %167 = vector.extract_strided_slice %160 {offsets = [0, 128], sizes = [8, 128], strides = [1, 1]} : vector<8x512xf32> to vector<8x128xf32>
    %168 = arith.negf %167 : vector<8x128xf32>
    %169 = math.exp %168 : vector<8x128xf32>
    %cst_40 = arith.constant 1.000000e+00 : f32
    %170 = vector.broadcast %cst_40 : f32 to vector<8x128xf32>
    %171 = arith.addf %170, %169 : vector<8x128xf32>
    %172 = arith.divf %170, %171 : vector<8x128xf32>
    %173 = vector.extract_strided_slice %160 {offsets = [0, 256], sizes = [8, 128], strides = [1, 1]} : vector<8x512xf32> to vector<8x128xf32>
    %174 = math.tanh %173 : vector<8x128xf32>
    %175 = vector.extract_strided_slice %160 {offsets = [0, 384], sizes = [8, 128], strides = [1, 1]} : vector<8x512xf32> to vector<8x128xf32>
    %176 = arith.negf %175 : vector<8x128xf32>
    %177 = math.exp %176 : vector<8x128xf32>
    %cst_41 = arith.constant 1.000000e+00 : f32
    %178 = vector.broadcast %cst_41 : f32 to vector<8x128xf32>
    %179 = arith.addf %178, %177 : vector<8x128xf32>
    %180 = arith.divf %178, %179 : vector<8x128xf32>
    %181 = arith.mulf %172, %153 : vector<8x128xf32>
    %182 = arith.mulf %166, %174 : vector<8x128xf32>
    %183 = arith.addf %181, %182 : vector<8x128xf32>
    %184 = math.tanh %183 : vector<8x128xf32>
    %185 = arith.mulf %180, %184 : vector<8x128xf32>
    %c6_i32 = arith.constant 6 : i32
    %186 = arith.index_cast %c6_i32 : i32 to index
    %c0_42 = arith.constant 0 : index
    %c0_43 = arith.constant 0 : index
    %187 = vector.load %arg1[%186, %c0_42, %c0_43] : memref<8x8x512xf32, #tpu.memory_space<vmem>>, vector<1x8x512xf32>
    %188 = vector.shape_cast %187 : vector<1x8x512xf32> to vector<8x512xf32>
    %cst_44 = arith.constant dense<0.000000e+00> : vector<8x512xf32>
    %189 = tpu.matmul %185, %3, %cst_44 {dimension_numbers = #tpu.dot_dimension_numbers<[1], [0], [0], [1], [0, 0, 1, 1], [], []>} : vector<8x128xf32>, vector<128x512xf32>, vector<8x512xf32> -> vector<8x512xf32>
    %190 = arith.addf %188, %189 : vector<8x512xf32>
    %191 = vector.extract_strided_slice %190 {offsets = [0, 0], sizes = [8, 128], strides = [1, 1]} : vector<8x512xf32> to vector<8x128xf32>
    %192 = arith.negf %191 : vector<8x128xf32>
    %193 = math.exp %192 : vector<8x128xf32>
    %cst_45 = arith.constant 1.000000e+00 : f32
    %194 = vector.broadcast %cst_45 : f32 to vector<8x128xf32>
    %195 = arith.addf %194, %193 : vector<8x128xf32>
    %196 = arith.divf %194, %195 : vector<8x128xf32>
    %197 = vector.extract_strided_slice %190 {offsets = [0, 128], sizes = [8, 128], strides = [1, 1]} : vector<8x512xf32> to vector<8x128xf32>
    %198 = arith.negf %197 : vector<8x128xf32>
    %199 = math.exp %198 : vector<8x128xf32>
    %cst_46 = arith.constant 1.000000e+00 : f32
    %200 = vector.broadcast %cst_46 : f32 to vector<8x128xf32>
    %201 = arith.addf %200, %199 : vector<8x128xf32>
    %202 = arith.divf %200, %201 : vector<8x128xf32>
    %203 = vector.extract_strided_slice %190 {offsets = [0, 256], sizes = [8, 128], strides = [1, 1]} : vector<8x512xf32> to vector<8x128xf32>
    %204 = math.tanh %203 : vector<8x128xf32>
    %205 = vector.extract_strided_slice %190 {offsets = [0, 384], sizes = [8, 128], strides = [1, 1]} : vector<8x512xf32> to vector<8x128xf32>
    %206 = arith.negf %205 : vector<8x128xf32>
    %207 = math.exp %206 : vector<8x128xf32>
    %cst_47 = arith.constant 1.000000e+00 : f32
    %208 = vector.broadcast %cst_47 : f32 to vector<8x128xf32>
    %209 = arith.addf %208, %207 : vector<8x128xf32>
    %210 = arith.divf %208, %209 : vector<8x128xf32>
    %211 = arith.mulf %202, %183 : vector<8x128xf32>
    %212 = arith.mulf %196, %204 : vector<8x128xf32>
    %213 = arith.addf %211, %212 : vector<8x128xf32>
    %214 = math.tanh %213 : vector<8x128xf32>
    %215 = arith.mulf %210, %214 : vector<8x128xf32>
    %c7_i32 = arith.constant 7 : i32
    %216 = arith.index_cast %c7_i32 : i32 to index
    %c0_48 = arith.constant 0 : index
    %c0_49 = arith.constant 0 : index
    %217 = vector.load %arg1[%216, %c0_48, %c0_49] : memref<8x8x512xf32, #tpu.memory_space<vmem>>, vector<1x8x512xf32>
    %218 = vector.shape_cast %217 : vector<1x8x512xf32> to vector<8x512xf32>
    %cst_50 = arith.constant dense<0.000000e+00> : vector<8x512xf32>
    %219 = tpu.matmul %215, %3, %cst_50 {dimension_numbers = #tpu.dot_dimension_numbers<[1], [0], [0], [1], [0, 0, 1, 1], [], []>} : vector<8x128xf32>, vector<128x512xf32>, vector<8x512xf32> -> vector<8x512xf32>
    %220 = arith.addf %218, %219 : vector<8x512xf32>
    %221 = vector.extract_strided_slice %220 {offsets = [0, 0], sizes = [8, 128], strides = [1, 1]} : vector<8x512xf32> to vector<8x128xf32>
    %222 = arith.negf %221 : vector<8x128xf32>
    %223 = math.exp %222 : vector<8x128xf32>
    %cst_51 = arith.constant 1.000000e+00 : f32
    %224 = vector.broadcast %cst_51 : f32 to vector<8x128xf32>
    %225 = arith.addf %224, %223 : vector<8x128xf32>
    %226 = arith.divf %224, %225 : vector<8x128xf32>
    %227 = vector.extract_strided_slice %220 {offsets = [0, 128], sizes = [8, 128], strides = [1, 1]} : vector<8x512xf32> to vector<8x128xf32>
    %228 = arith.negf %227 : vector<8x128xf32>
    %229 = math.exp %228 : vector<8x128xf32>
    %cst_52 = arith.constant 1.000000e+00 : f32
    %230 = vector.broadcast %cst_52 : f32 to vector<8x128xf32>
    %231 = arith.addf %230, %229 : vector<8x128xf32>
    %232 = arith.divf %230, %231 : vector<8x128xf32>
    %233 = vector.extract_strided_slice %220 {offsets = [0, 256], sizes = [8, 128], strides = [1, 1]} : vector<8x512xf32> to vector<8x128xf32>
    %234 = math.tanh %233 : vector<8x128xf32>
    %235 = vector.extract_strided_slice %220 {offsets = [0, 384], sizes = [8, 128], strides = [1, 1]} : vector<8x512xf32> to vector<8x128xf32>
    %236 = arith.negf %235 : vector<8x128xf32>
    %237 = math.exp %236 : vector<8x128xf32>
    %cst_53 = arith.constant 1.000000e+00 : f32
    %238 = vector.broadcast %cst_53 : f32 to vector<8x128xf32>
    %239 = arith.addf %238, %237 : vector<8x128xf32>
    %240 = arith.divf %238, %239 : vector<8x128xf32>
    %241 = arith.mulf %232, %213 : vector<8x128xf32>
    %242 = arith.mulf %226, %234 : vector<8x128xf32>
    %243 = arith.addf %241, %242 : vector<8x128xf32>
    %244 = math.tanh %243 : vector<8x128xf32>
    %245 = arith.mulf %240, %244 : vector<8x128xf32>
    %c8_i32 = arith.constant 8 : i32
    %c0_54 = arith.constant 0 : index
    %c0_55 = arith.constant 0 : index
    %246 = vector.load %arg4[%c0_54, %c0_55] : memref<8x128xf32, #tpu.memory_space<vmem>>, vector<8x128xf32>
    tpu.vector_store %arg4[%c0_54, %c0_55], %245 {strides = array<i32>} : memref<8x128xf32, #tpu.memory_space<vmem>>, vector<8x128xf32>,
    %c0_56 = arith.constant 0 : index
    %c0_57 = arith.constant 0 : index
    %247 = vector.load %arg5[%c0_56, %c0_57] : memref<8x128xf32, #tpu.memory_space<vmem>>, vector<8x128xf32>
    tpu.vector_store %arg5[%c0_56, %c0_57], %243 {strides = array<i32>} : memref<8x128xf32, #tpu.memory_space<vmem>>, vector<8x128xf32>,
    %c0_58 = arith.constant 0 : index
    %c0_59 = arith.constant 0 : index
    %248 = vector.load %arg3[%c0_58, %c0_59] : memref<8x128xf32, #tpu.memory_space<vmem>>, vector<8x128xf32>
    tpu.vector_store %arg3[%c0_58, %c0_59], %245 {strides = array<i32>} : memref<8x128xf32, #tpu.memory_space<vmem>>, vector<8x128xf32>,
    return
  }
  func.func @transform_0(%arg0: i32) -> (i32, i32, i32) {
    %c0_i32 = arith.constant 0 : i32
    %c0_i32_0 = arith.constant 0 : i32
    %c0_i32_1 = arith.constant 0 : i32
    return %arg0, %c0_i32, %c0_i32_0 : i32, i32, i32
  }
  func.func @transform_1(%arg0: i32) -> (i32, i32) {
    %c0_i32 = arith.constant 0 : i32
    %c0_i32_0 = arith.constant 0 : i32
    %c0_i32_1 = arith.constant 0 : i32
    return %c0_i32, %c0_i32_0 : i32, i32
  }
  func.func @transform_2(%arg0: i32) -> (i32, i32) {
    %c0_i32 = arith.constant 0 : i32
    %c0_i32_0 = arith.constant 0 : i32
    %c0_i32_1 = arith.constant 0 : i32
    return %c0_i32, %c0_i32_0 : i32, i32
  }
}

</mosaic_0001>

<bundles_post_ra>
// kernel: tpu_custom_call.1
= control target key start
LH: loop header
LB: loop body
LE: loop exit
PB: predicated region body
PF: predicated region fallthrough
CT: control target
= control target key end

     0   :  { %7 = vsyncpa [#allocation5], 0  ;;  %s2691_s0 = inlined_call_operand.hbm [shape: f32[8,8,512], index: 0, kind: input, shape index: {}]   ;;  %s2692_s1 = inlined_call_operand.hbm [shape: f32[128,512], index: 1, kind: input, shape index: {}]   ;;  %s2693_s2 = inlined_call_operand.hbm [shape: f32[8,128], index: 2, kind: output, shape index: {}]  }
   0x1   :  { %8 = vsyncpa [#allocation8], 0 }
   0x2   :  { %9 = vsyncpa [#allocation6], 0  ;;  %s2272_s9 = smov [#allocation4]   ;;  %s2200_s13 = scalar_lea.hbm %s2691_s0, 4096 }
   0x3   :  { %s15_s10 = sshll.u32 %s2272_s9, 4  ;;  %p2201_p0 = scmp.ne.s32.totalorder %s2691_s0, %s2200_s13  ;;  %s16_s10 = int_to_ptr.vmem [resolvable:$true] %s15_s10 }
   0x4   :  { %p2204_p1 = scmp.lt.u32.totalorder %s2200_s13, %s2691_s0 }
   0x6   :  { %p2206_p2 = pnand %p2204_p1, %p2201_p0 }
   0x8   :  { %2209 = shalt.err (!%p2206_p2)
}
   0x9   :  { %s2210_s18 = scalar_lea.vmem %s16_s10, 4096  ;;  %p2215_p4 = scmp.lt.s32.totalorder %s16_s10, %s16_s10 }
   0xa   :  { %p2211_p3 = scmp.ne.s32.totalorder %s16_s10, %s2210_s18  ;;  %p2216_p5 = scmp.lt.s32.totalorder %s2210_s18, %s2210_s18 }
   0xc   :  { %p2217_p6 = por %p2216_p5, %p2215_p4 }
   0xe   :  { %p2218_p7 = pnand %p2217_p6, %p2211_p3 }
  0x10   :  { %2221 = shalt.err (!%p2218_p7)
}
  0x11   :  { %s2273_s19 = smov 512   ;;  %s2274_s20 = smov 32  }
  0x12   :  { %21 = dma.hbm_to_vmem [thread:$0]  %s2691_s0, 4096, %s16_s10, [#allocation5], %s2273_s19, %s2273_s19, %s2274_s20  }
  0x13   :  { %s2275_s23 = smov [#allocation7]   ;;  %s2222_s27 = scalar_lea.hbm %s2692_s1, 8192 }
  0x14   :  { %s27_s24 = sshll.u32 %s2275_s23, 4  ;;  %p2223_p8 = scmp.ne.s32.totalorder %s2692_s1, %s2222_s27  ;;  %s28_s24 = int_to_ptr.vmem [resolvable:$true] %s27_s24 }
  0x15   :  { %p2226_p9 = scmp.lt.u32.totalorder %s2222_s27, %s2692_s1 }
  0x17   :  { %p2228_p10 = pnand %p2226_p9, %p2223_p8 }
  0x19   :  { %2231 = shalt.err (!%p2228_p10)
}
  0x1a   :  { %s2232_s4 = scalar_lea.vmem %s28_s24, 8192  ;;  %p2237_p12 = scmp.lt.s32.totalorder %s28_s24, %s28_s24 }
  0x1b   :  { %p2233_p11 = scmp.ne.s32.totalorder %s28_s24, %s2232_s4  ;;  %p2238_p13 = scmp.lt.s32.totalorder %s2232_s4, %s2232_s4 }
  0x1d   :  { %p2239_p0 = por %p2238_p13, %p2237_p12 }
  0x1f   :  { %p2240_p1 = pnand %p2239_p0, %p2233_p11 }
  0x21   :  { %2243 = shalt.err (!%p2240_p1)
}
  0x22   :  { %33 = dma.hbm_to_vmem [thread:$0]  %s2692_s1, 8192, %s28_s24, [#allocation8], %s2273_s19, %s2273_s19, %s2274_s20  }
  0x23   :  { %2266 = dma.done.wait [#allocation5], 4096  }
  0x24   :  { %2267 = vsyncadd [#allocation5], 4294963200 }
  0x25   :  { %2268 = dma.done.wait [#allocation8], 8192  }
  0x26   :  { %2269 = vsyncadd [#allocation8], 4294959104  ;;  %v2276_v0 = vmov 0.0   ;;  %v47_v1 = vld [vmem:[#allocation7 + $0x8] sm:$0xff]  ;;  %v46_v3 = vld [vmem:[#allocation7] sm:$0xff]  ;;  %s2277_s1 = smov [#allocation9]  }
  0x27   :  { %180 = vmatprep.mubr.f32.mxu0 %v2276_v0  ;;  %251 = vmatprep.mubr.f32.mxu1 %v2276_v0  ;;  %v51_v2 = vld [vmem:[#allocation7 + $0x28] sm:$0xff]  ;;  %v50_v5 = vld [vmem:[#allocation7 + $0x20] sm:$0xff]  ;;  %v49_v19 = vld [vmem:[#allocation7 + $0x18] sm:$0xff]  ;;  %s1520_s6 = sshll.u32 %s2277_s1, 4  ;;  %s1521_s6 = int_to_ptr.vmem [resolvable:$true] %s1520_s6 }
  0x28   :  { %v2319_v4 = vpack.c.bf16 %v51_v2, %v47_v1  ;;  %v55_v6 = vld [vmem:[#allocation7 + $0x48] sm:$0xff]  ;;  %v2321_v8 = vpack.c.bf16 %v50_v5, %v46_v3  ;;  %v54_v10 = vld [vmem:[#allocation7 + $0x40] sm:$0xff]  ;;  %v53_v20 = vld [vmem:[#allocation7 + $0x38] sm:$0xff]  ;;  %s2244_s7 = scalar_lea.vmem %s1521_s6, 128  ;;  %p2249_p3 = scmp.lt.s32.totalorder %s1521_s6, %s1521_s6 }
  0x29   :  { %v59_v7 = vld [vmem:[#allocation7 + $0x68] sm:$0xff]  ;;  %v58_v11 = vld [vmem:[#allocation7 + $0x60] sm:$0xff]  ;;  %v2332_v22 = vpack.c.bf16 %v53_v20, %v49_v19  ;;  %v48_v23 = vld [vmem:[#allocation7 + $0x10] sm:$0xff]  ;;  %p2245_p2 = scmp.ne.s32.totalorder %s1521_s6, %s2244_s7  ;;  %p2250_p4 = scmp.lt.s32.totalorder %s2244_s7, %s2244_s7 }
  0x2a   :  { %v2323_v9 = vpack.c.bf16 %v59_v7, %v55_v6  ;;  %v63_v12 = vld [vmem:[#allocation7 + $0x88] sm:$0xff]  ;;  %1555 = vmatprep.subr.bf16.mxu0 %v2319_v4  ;;  %v2327_v14 = vpack.c.bf16 %v58_v11, %v54_v10  ;;  %v62_v15 = vld [vmem:[#allocation7 + $0x80] sm:$0xff]  ;;  %v52_v24 = vld [vmem:[#allocation7 + $0x30] sm:$0xff] }
  0x2b   :  { %v67_v13 = vld [vmem:[#allocation7 + $0xa8] sm:$0xff]  ;;  %1557 = vmatpush1.bf16.msra.mxu0 %v2321_v8  ;;  %v66_v16 = vld [vmem:[#allocation7 + $0xa0] sm:$0xff]  ;;  %v2334_v25 = vpack.c.bf16 %v52_v24, %v48_v23  ;;  %1587 = vmatprep.subr.bf16.mxu1 %v2332_v22  ;;  %v57_v27 = vld [vmem:[#allocation7 + $0x58] sm:$0xff]  ;;  %p2251_p5 = por %p2250_p4, %p2249_p3 }
  0x2c   :  { %1559 = vmatprep.subr.bf16.mxu0 %v2323_v9  ;;  %v2330_v17 = vpack.c.bf16 %v67_v13, %v63_v12  ;;  %v71_v18 = vld [vmem:[#allocation7 + $0xc8] sm:$0xff]  ;;  %v2337_v26 = vpack.c.bf16 %v66_v16, %v62_v15  ;;  %v61_v28 = vld [vmem:[#allocation7 + $0x78] sm:$0xff]  ;;  %v56_v29 = vld [vmem:[#allocation7 + $0x50] sm:$0xff] }
  0x2d   :  { %v75_v21 = vld [vmem:[#allocation7 + $0xe8] sm:$0xff]  ;;  %v70_v31 = vld [vmem:[#allocation7 + $0xc0] sm:$0xff]  ;;  %1589 = vmatpush1.bf16.msra.mxu1 %v2334_v25  ;;  %v2344_v33 = vpack.c.bf16 %v61_v28, %v57_v27  ;;  %v60_v34 = vld [vmem:[#allocation7 + $0x70] sm:$0xff]  ;;  %p2252_p6 = pnand %p2251_p5, %p2245_p2 }
  0x2e   :  { %v2341_v30 = vpack.c.bf16 %v75_v21, %v71_v18  ;;  %v74_v32 = vld [vmem:[#allocation7 + $0xe0] sm:$0xff]  ;;  %v79_v35 = vld [vmem:[#allocation7 + $0x108] sm:$0xff]  ;;  %v2346_v37 = vpack.c.bf16 %v60_v34, %v56_v29  ;;  %v65_v38 = vld [vmem:[#allocation7 + $0x98] sm:$0xff] }
  0x2f   :  { %1561 = vmatpush1.bf16.msra.mxu0 %v2327_v14  ;;  %v83_v36 = vld [vmem:[#allocation7 + $0x128] sm:$0xff]  ;;  %1591 = vmatprep.subr.bf16.mxu1 %v2344_v33  ;;  %v69_v39 = vld [vmem:[#allocation7 + $0xb8] sm:$0xff]  ;;  %v64_v40 = vld [vmem:[#allocation7 + $0x90] sm:$0xff]  ;;  %v2350_v42 = vpack.c.bf16 %v74_v32, %v70_v31 }
  0x30   :  { %1563 = vmatprep.subr.bf16.mxu0 %v2330_v17  ;;  %v68_v41 = vld [vmem:[#allocation7 + $0xb0] sm:$0xff]  ;;  %v78_v43 = vld [vmem:[#allocation7 + $0x100] sm:$0xff]  ;;  %v2352_v45 = vpack.c.bf16 %v69_v39, %v65_v38  ;;  %v2355_v46 = vpack.c.bf16 %v83_v36, %v79_v35  ;;  %v87_v47 = vld [vmem:[#allocation7 + $0x148] sm:$0xff] }
  0x31   :  { %v82_v44 = vld [vmem:[#allocation7 + $0x120] sm:$0xff]  ;;  %1593 = vmatpush1.bf16.msra.mxu1 %v2346_v37  ;;  %v2358_v48 = vpack.c.bf16 %v68_v41, %v64_v40  ;;  %v73_v49 = vld [vmem:[#allocation7 + $0xd8] sm:$0xff]  ;;  %v91_v51 = vld [vmem:[#allocation7 + $0x168] sm:$0xff] }
  0x32   :  { %v77_v50 = vld [vmem:[#allocation7 + $0xf8] sm:$0xff]  ;;  %1595 = vmatprep.subr.bf16.mxu1 %v2352_v45  ;;  %v72_v53 = vld [vmem:[#allocation7 + $0xd0] sm:$0xff]  ;;  %v2364_v55 = vpack.c.bf16 %v82_v44, %v78_v43  ;;  %v2367_v58 = vpack.c.bf16 %v91_v51, %v87_v47  ;;  %v86_v59 = vld [vmem:[#allocation7 + $0x140] sm:$0xff] }
  0x33   :  { %1565 = vmatpush1.bf16.msra.mxu0 %v2337_v26  ;;  %v2361_v52 = vpack.c.bf16 %v77_v50, %v73_v49  ;;  %v76_v54 = vld [vmem:[#allocation7 + $0xf0] sm:$0xff]  ;;  %v81_v56 = vld [vmem:[#allocation7 + $0x118] sm:$0xff]  ;;  %v90_v60 = vld [vmem:[#allocation7 + $0x160] sm:$0xff] }
  0x34   :  { %1567 = vmatprep.subr.bf16.mxu0 %v2341_v30  ;;  %v85_v57 = vld [vmem:[#allocation7 + $0x138] sm:$0xff]  ;;  %v95_v61 = vld [vmem:[#allocation7 + $0x188] sm:$0xff]  ;;  %v2370_v62 = vpack.c.bf16 %v76_v54, %v72_v53  ;;  %v80_v2 = vld [vmem:[#allocation7 + $0x110] sm:$0xff]  ;;  %v2376_v7 = vpack.c.bf16 %v90_v60, %v86_v59 }
  0x35   :  { %1597 = vmatpush1.bf16.msra.mxu1 %v2358_v48  ;;  %v99_v63 = vld [vmem:[#allocation7 + $0x1a8] sm:$0xff]  ;;  %v2373_v1 = vpack.c.bf16 %v85_v57, %v81_v56  ;;  %v84_v3 = vld [vmem:[#allocation7 + $0x130] sm:$0xff]  ;;  %v89_v5 = vld [vmem:[#allocation7 + $0x158] sm:$0xff] }
  0x36   :  { %1599 = vmatprep.subr.bf16.mxu1 %v2361_v52  ;;  %v93_v6 = vld [vmem:[#allocation7 + $0x178] sm:$0xff]  ;;  %v2379_v10 = vpack.c.bf16 %v99_v63, %v95_v61  ;;  %v94_v11 = vld [vmem:[#allocation7 + $0x180] sm:$0xff]  ;;  %v103_v13 = vld [vmem:[#allocation7 + $0x1c8] sm:$0xff]  ;;  %v2382_v15 = vpack.c.bf16 %v84_v3, %v80_v2 }
  0x37   :  { %1569 = vmatpush1.bf16.msra.mxu0 %v2350_v42  ;;  %v98_v12 = vld [vmem:[#allocation7 + $0x1a0] sm:$0xff]  ;;  %v107_v16 = vld [vmem:[#allocation7 + $0x1e8] sm:$0xff]  ;;  %v2385_v18 = vpack.c.bf16 %v93_v6, %v89_v5  ;;  %v88_v19 = vld [vmem:[#allocation7 + $0x150] sm:$0xff] }
  0x38   :  { %1571 = vmatprep.subr.bf16.mxu0 %v2355_v46  ;;  %v92_v20 = vld [vmem:[#allocation7 + $0x170] sm:$0xff]  ;;  %v97_v21 = vld [vmem:[#allocation7 + $0x198] sm:$0xff]  ;;  %v2388_v24 = vpack.c.bf16 %v98_v12, %v94_v11  ;;  %v2391_v27 = vpack.c.bf16 %v107_v16, %v103_v13  ;;  %v102_v28 = vld [vmem:[#allocation7 + $0x1c0] sm:$0xff] }
  0x39   :  { %1601 = vmatpush1.bf16.msra.mxu1 %v2370_v62  ;;  %v101_v23 = vld [vmem:[#allocation7 + $0x1b8] sm:$0xff]  ;;  %v106_v29 = vld [vmem:[#allocation7 + $0x1e0] sm:$0xff]  ;;  %v2394_v31 = vpack.c.bf16 %v92_v20, %v88_v19  ;;  %v96_v34 = vld [vmem:[#allocation7 + $0x190] sm:$0xff] }
  0x3a   :  { %1603 = vmatprep.subr.bf16.mxu1 %v2373_v1  ;;  %v2397_v32 = vpack.c.bf16 %v101_v23, %v97_v21  ;;  %v100_v35 = vld [vmem:[#allocation7 + $0x1b0] sm:$0xff]  ;;  %v105_v36 = vld [vmem:[#allocation7 + $0x1d8] sm:$0xff]  ;;  %v2400_v39 = vpack.c.bf16 %v106_v29, %v102_v28  ;;  %v112_v49 = vld [vmem:[#allocation4] sm:$0xff] }
  0x3b   :  { %1573 = vmatpush1.bf16.msra.mxu0 %v2364_v55  ;;  %v109_v38 = vld [vmem:[#allocation7 + $0x1f8] sm:$0xff]  ;;  %v2404_v40 = vpack.c.bf16 %v100_v35, %v96_v34  ;;  %v104_v43 = vld [vmem:[#allocation7 + $0x1d0] sm:$0xff]  ;;  %v113_v50 = vld [vmem:[#allocation4 + $0x8] sm:$0xff] }
  0x3c   :  { %1575 = vmatprep.subr.bf16.mxu0 %v2367_v58  ;;  %v2407_v41 = vpack.c.bf16 %v109_v38, %v105_v36  ;;  %v108_v44 = vld [vmem:[#allocation7 + $0x1f0] sm:$0xff]  ;;  %v115_v60 = vld [vmem:[#allocation4 + $0x18] sm:$0xff] }
  0x3d   :  { %1605 = vmatpush1.bf16.msra.mxu1 %v2382_v15  ;;  %v2411_v47 = vpack.c.bf16 %v108_v44, %v104_v43  ;;  %v114_v3 = vld [vmem:[#allocation4 + $0x10] sm:$0xff]  ;;  %v287_v44 = vld [vmem:[#allocation4 + $0x20] sm:$0xff] }
  0x3e   :  { %1607 = vmatprep.subr.bf16.mxu1 %v2385_v18 }
  0x3f   :  { %1577 = vmatpush1.bf16.msra.mxu0 %v2376_v7 }
  0x40   :  { %1579 = vmatprep.subr.bf16.mxu0 %v2379_v10 }
  0x41   :  { %1609 = vmatpush1.bf16.msra.mxu1 %v2394_v31 }
  0x42   :  { %1611 = vmatprep.subr.bf16.mxu1 %v2397_v32 }
  0x43   :  { %1581 = vmatpush1.bf16.msra.mxu0 %v2388_v24 }
  0x44   :  { %1583 = vmatprep.subr.bf16.mxu0 %v2391_v27 }
  0x45   :  { %1613 = vmatpush1.bf16.msra.mxu1 %v2404_v40 }
  0x46   :  { %1615 = vmatprep.subr.bf16.mxu1 %v2407_v41 }
  0x47   :  { %1585 = vmatpush1.bf16.msra.mxu0 %v2400_v39 }
  0x48   :  { %1619 = vmatprep.subr.bf16.mxu0 %v2319_v4 }
  0x49   :  { %1617 = vmatpush1.bf16.msra.mxu1 %v2411_v47 }
  0x4a   :  { %181 = vmatmul.mubr.f32.vlgmr.msra.gmra.mrb[0].mxu0 %v2276_v0  ;;  %1651 = vmatprep.subr.bf16.mxu1 %v2332_v22 }
  0x4b   :  { %1621 = vmatpush1.bf16.msra.mxu0 %v2321_v8  ;;  %355 = vmatprep.mubr.f32.mxu0 %v2276_v0 }
  0x4c   :  { %1623 = vmatprep.subr.bf16.mxu0 %v2323_v9  ;;  %252 = vmatmul.mubr.f32.vlgmr.msra.gmra.mrb[0].mxu1 %v2276_v0 }
  0x4d   :  { %1653 = vmatpush1.bf16.msra.mxu1 %v2334_v25  ;;  %426 = vmatprep.mubr.f32.mxu1 %v2276_v0 }
  0x4e   :  { %1655 = vmatprep.subr.bf16.mxu1 %v2344_v33 }
  0x4f   :  { %1625 = vmatpush1.bf16.msra.mxu0 %v2327_v14 }
  0x50   :  { %1627 = vmatprep.subr.bf16.mxu0 %v2330_v17 }
  0x51   :  { %1657 = vmatpush1.bf16.msra.mxu1 %v2346_v37 }
  0x52   :  { %1659 = vmatprep.subr.bf16.mxu1 %v2352_v45 }
  0x53   :  { %1629 = vmatpush1.bf16.msra.mxu0 %v2337_v26 }
  0x54   :  { %1631 = vmatprep.subr.bf16.mxu0 %v2341_v30 }
  0x55   :  { %1661 = vmatpush1.bf16.msra.mxu1 %v2358_v48 }
  0x56   :  { %1663 = vmatprep.subr.bf16.mxu1 %v2361_v52 }
  0x57   :  { %1633 = vmatpush1.bf16.msra.mxu0 %v2350_v42 }
  0x58   :  { %1635 = vmatprep.subr.bf16.mxu0 %v2355_v46 }
  0x59   :  { %1665 = vmatpush1.bf16.msra.mxu1 %v2370_v62 }
  0x5a   :  { %1667 = vmatprep.subr.bf16.mxu1 %v2373_v1 }
  0x5b   :  { %1637 = vmatpush1.bf16.msra.mxu0 %v2364_v55 }
  0x5c   :  { %1639 = vmatprep.subr.bf16.mxu0 %v2367_v58 }
  0x5d   :  { %1669 = vmatpush1.bf16.msra.mxu1 %v2382_v15 }
  0x5e   :  { %1671 = vmatprep.subr.bf16.mxu1 %v2385_v18 }
  0x5f   :  { %1641 = vmatpush1.bf16.msra.mxu0 %v2376_v7 }
  0x60   :  { %1643 = vmatprep.subr.bf16.mxu0 %v2379_v10 }
  0x61   :  { %1673 = vmatpush1.bf16.msra.mxu1 %v2394_v31 }
  0x62   :  { %1675 = vmatprep.subr.bf16.mxu1 %v2397_v32 }
  0x63   :  { %1645 = vmatpush1.bf16.msra.mxu0 %v2388_v24 }
  0x64   :  { %1647 = vmatprep.subr.bf16.mxu0 %v2391_v27 }
  0x65   :  { %1677 = vmatpush1.bf16.msra.mxu1 %v2404_v40 }
  0x66   :  { %1679 = vmatprep.subr.bf16.mxu1 %v2407_v41 }
  0x67   :  { %1649 = vmatpush1.bf16.msra.mxu0 %v2400_v39 }
  0x68   :  { %1683 = vmatprep.subr.bf16.mxu0 %v2319_v4 }
  0x69   :  { %1681 = vmatpush1.bf16.msra.mxu1 %v2411_v47 }
  0x6a   :  { %1715 = vmatprep.subr.bf16.mxu1 %v2332_v22 }
 0x11d   :  { %v182_v51 = vpop.f32.mrb[0].mxu0 }
 0x11e   :  { %v258_v53 = vadd.f32 %v182_v51, %v112_v49  ;;  %v184_v54 = vpop.f32.mrb[1].mxu0  ;;  %v288_v49 = vld [vmem:[#allocation4 + $0x28] sm:$0xff] }
 0x11f   :  { %v259_v56 = vadd.f32 %v184_v54, %v113_v50  ;;  %v253_v61 = vpop.f32.mrb[0].mxu1 }
 0x120   :  { %v1530_v57 = vmul.f32 -1.442695, %v258_v53  ;;  %v255_v63 = vpop.f32.mrb[1].mxu1  ;;  %v260_v6 = vadd.f32 %v253_v61, %v114_v3  ;;  %v290_v61 = vld [vmem:[#allocation4 + $0x38] sm:$0xff] }
 0x121   :  { %v1531_v59 = vmul.f32 -1.442695, %v259_v56  ;;  %v261_v2 = vadd.f32 %v255_v63, %v115_v60 }
 0x122   :  { %2072 = vpow2.f32 %v1530_v57 }
 0x123   :  { %2074 = vpow2.f32 %v1531_v59  ;;  %v1532_v5 = vmul.f32 -1.442695, %v261_v2  ;;  %v289_v2 = vld [vmem:[#allocation4 + $0x30] sm:$0xff] }
 0x125   :  { %2076 = vpow2.f32 %v1532_v5 }
 0x126   :  { %2078 = vtanh.f32 %v260_v6 }
 0x12c   :  { %v2073_v11 = vpop.eup %2072 }
 0x12d   :  { %v2075_v12 = vpop.eup %2074  ;;  %v265_v13 = vadd.f32 1.0, %v2073_v11 }
 0x12e   :  { %v271_v16 = vadd.f32 1.0, %v2075_v12 }
 0x12f   :  { %2080 = vrcp.f32 %v265_v13  ;;  %v2077_v19 = vpop.eup %2076 }
 0x130   :  { %2082 = vrcp.f32 %v271_v16  ;;  %v2079_v20 = vpop.eup %2078  ;;  %v278_v23 = vadd.f32 1.0, %v2077_v19 }
 0x132   :  { %2084 = vrcp.f32 %v278_v23 }
 0x139   :  { %v2081_v21 = vpop.eup %2080 }
 0x13a   :  { %v2083_v28 = vpop.eup %2082  ;;  %v282_v29 = vmul.f32 %v2081_v21, %v2079_v20 }
 0x13b   :  { %v281_v34 = vmul.f32 0.0, %v2083_v28 }
 0x13c   :  { %v2085_v36 = vpop.eup %2084 }
 0x13d   :  { %v2453_v35 = vadd.f32 %v282_v29, %v281_v34 }
 0x13f   :  { %2086 = vtanh.f32 %v2453_v35 }
 0x149   :  { %v2087_v38 = vpop.eup %2086 }
 0x14a   :  { %v285_v43 = vmul.f32 %v2087_v38, %v2085_v36 }
 0x14c   :  { %356 = vmatmul.mubr.f32.vlgmr.msra.gmra.mrb[2].mxu0 %v285_v43  ;;  %427 = vmatmul.mubr.f32.vlgmr.msra.gmra.mrb[2].mxu1 %v285_v43 }
 0x14d   :  { %1685 = vmatpush1.bf16.msra.mxu0 %v2321_v8  ;;  %1717 = vmatpush1.bf16.msra.mxu1 %v2334_v25 }
 0x14e   :  { %1687 = vmatprep.subr.bf16.mxu0 %v2323_v9  ;;  %1719 = vmatprep.subr.bf16.mxu1 %v2344_v33 }
 0x14f   :  { %530 = vmatprep.mubr.f32.mxu0 %v2276_v0  ;;  %601 = vmatprep.mubr.f32.mxu1 %v2276_v0 }
 0x151   :  { %1689 = vmatpush1.bf16.msra.mxu0 %v2327_v14  ;;  %1721 = vmatpush1.bf16.msra.mxu1 %v2346_v37 }
 0x152   :  { %1691 = vmatprep.subr.bf16.mxu0 %v2330_v17  ;;  %1723 = vmatprep.subr.bf16.mxu1 %v2352_v45 }
 0x155   :  { %1693 = vmatpush1.bf16.msra.mxu0 %v2337_v26  ;;  %1725 = vmatpush1.bf16.msra.mxu1 %v2358_v48 }
 0x156   :  { %1695 = vmatprep.subr.bf16.mxu0 %v2341_v30  ;;  %1727 = vmatprep.subr.bf16.mxu1 %v2361_v52 }
 0x159   :  { %1697 = vmatpush1.bf16.msra.mxu0 %v2350_v42  ;;  %1729 = vmatpush1.bf16.msra.mxu1 %v2370_v62 }
 0x15a   :  { %1699 = vmatprep.subr.bf16.mxu0 %v2355_v46  ;;  %1731 = vmatprep.subr.bf16.mxu1 %v2373_v1 }
 0x15d   :  { %1701 = vmatpush1.bf16.msra.mxu0 %v2364_v55  ;;  %1733 = vmatpush1.bf16.msra.mxu1 %v2382_v15 }
 0x15e   :  { %1703 = vmatprep.subr.bf16.mxu0 %v2367_v58  ;;  %1735 = vmatprep.subr.bf16.mxu1 %v2385_v18 }
 0x161   :  { %1705 = vmatpush1.bf16.msra.mxu0 %v2376_v7  ;;  %1737 = vmatpush1.bf16.msra.mxu1 %v2394_v31 }
 0x162   :  { %1707 = vmatprep.subr.bf16.mxu0 %v2379_v10  ;;  %1739 = vmatprep.subr.bf16.mxu1 %v2397_v32 }
 0x165   :  { %1709 = vmatpush1.bf16.msra.mxu0 %v2388_v24  ;;  %1741 = vmatpush1.bf16.msra.mxu1 %v2404_v40 }
 0x166   :  { %1711 = vmatprep.subr.bf16.mxu0 %v2391_v27  ;;  %1743 = vmatprep.subr.bf16.mxu1 %v2407_v41 }
 0x169   :  { %1713 = vmatpush1.bf16.msra.mxu0 %v2400_v39  ;;  %1745 = vmatpush1.bf16.msra.mxu1 %v2411_v47 }
 0x16a   :  { %1747 = vmatprep.subr.bf16.mxu0 %v2319_v4  ;;  %1779 = vmatprep.subr.bf16.mxu1 %v2332_v22 }
 0x21f   :  { %v357_v50 = vpop.f32.mrb[2].mxu0  ;;  %v428_v51 = vpop.f32.mrb[2].mxu1 }
 0x220   :  { %v433_v53 = vadd.f32 %v357_v50, %v287_v44  ;;  %v359_v54 = vpop.f32.mrb[3].mxu0  ;;  %v430_v56 = vpop.f32.mrb[3].mxu1  ;;  %v435_v5 = vadd.f32 %v428_v51, %v289_v2  ;;  %v463_v44 = vld [vmem:[#allocation4 + $0x48] sm:$0xff] }
 0x221   :  { %v434_v57 = vadd.f32 %v359_v54, %v288_v49  ;;  %v436_v63 = vadd.f32 %v430_v56, %v290_v61 }
 0x222   :  { %v1533_v59 = vmul.f32 -1.442695, %v433_v53 }
 0x223   :  { %v1534_v60 = vmul.f32 -1.442695, %v434_v57  ;;  %v1535_v3 = vmul.f32 -1.442695, %v436_v63  ;;  %v464_v63 = vld [vmem:[#allocation4 + $0x50] sm:$0xff] }
 0x224   :  { %2088 = vpow2.f32 %v1533_v59 }
 0x225   :  { %2090 = vpow2.f32 %v1534_v60  ;;  %v465_v60 = vld [vmem:[#allocation4 + $0x58] sm:$0xff] }
 0x226   :  { %2092 = vpow2.f32 %v1535_v3 }
 0x227   :  { %2094 = vtanh.f32 %v435_v5 }
 0x22e   :  { %v2089_v6 = vpop.eup %2088 }
 0x22f   :  { %v2091_v11 = vpop.eup %2090  ;;  %v440_v12 = vadd.f32 1.0, %v2089_v6 }
 0x230   :  { %v446_v13 = vadd.f32 1.0, %v2091_v11  ;;  %v2093_v16 = vpop.eup %2092 }
 0x231   :  { %2096 = vrcp.f32 %v440_v12  ;;  %v2095_v19 = vpop.eup %2094  ;;  %v453_v28 = vadd.f32 1.0, %v2093_v16 }
 0x232   :  { %2098 = vrcp.f32 %v446_v13 }
 0x233   :  { %2100 = vrcp.f32 %v453_v28 }
 0x23b   :  { %v2097_v20 = vpop.eup %2096 }
 0x23c   :  { %v2099_v21 = vpop.eup %2098  ;;  %v457_v23 = vmul.f32 %v2097_v20, %v2095_v19 }
 0x23d   :  { %v456_v29 = vmul.f32 %v2099_v21, %v2453_v35  ;;  %v2101_v36 = vpop.eup %2100  ;;  %v462_v35 = vld [vmem:[#allocation4 + $0x40] sm:$0xff] }
 0x23f   :  { %v2491_v34 = vadd.f32 %v457_v23, %v456_v29 }
 0x241   :  { %2102 = vtanh.f32 %v2491_v34 }
 0x24b   :  { %v2103_v38 = vpop.eup %2102 }
 0x24c   :  { %v460_v43 = vmul.f32 %v2103_v38, %v2101_v36 }
 0x24e   :  { %531 = vmatmul.mubr.f32.vlgmr.msra.gmra.mrb[4].mxu0 %v460_v43  ;;  %602 = vmatmul.mubr.f32.vlgmr.msra.gmra.mrb[4].mxu1 %v460_v43 }
 0x24f   :  { %1749 = vmatpush1.bf16.msra.mxu0 %v2321_v8  ;;  %1781 = vmatpush1.bf16.msra.mxu1 %v2334_v25 }
 0x250   :  { %1751 = vmatprep.subr.bf16.mxu0 %v2323_v9  ;;  %1783 = vmatprep.subr.bf16.mxu1 %v2344_v33 }
 0x251   :  { %705 = vmatprep.mubr.f32.mxu0 %v2276_v0  ;;  %776 = vmatprep.mubr.f32.mxu1 %v2276_v0 }
 0x253   :  { %1753 = vmatpush1.bf16.msra.mxu0 %v2327_v14  ;;  %1785 = vmatpush1.bf16.msra.mxu1 %v2346_v37 }
 0x254   :  { %1755 = vmatprep.subr.bf16.mxu0 %v2330_v17  ;;  %1787 = vmatprep.subr.bf16.mxu1 %v2352_v45 }
 0x257   :  { %1757 = vmatpush1.bf16.msra.mxu0 %v2337_v26  ;;  %1789 = vmatpush1.bf16.msra.mxu1 %v2358_v48 }
 0x258   :  { %1759 = vmatprep.subr.bf16.mxu0 %v2341_v30  ;;  %1791 = vmatprep.subr.bf16.mxu1 %v2361_v52 }
 0x25b   :  { %1761 = vmatpush1.bf16.msra.mxu0 %v2350_v42  ;;  %1793 = vmatpush1.bf16.msra.mxu1 %v2370_v62 }
 0x25c   :  { %1763 = vmatprep.subr.bf16.mxu0 %v2355_v46  ;;  %1795 = vmatprep.subr.bf16.mxu1 %v2373_v1 }
 0x25f   :  { %1765 = vmatpush1.bf16.msra.mxu0 %v2364_v55  ;;  %1797 = vmatpush1.bf16.msra.mxu1 %v2382_v15 }
 0x260   :  { %1767 = vmatprep.subr.bf16.mxu0 %v2367_v58  ;;  %1799 = vmatprep.subr.bf16.mxu1 %v2385_v18 }
 0x263   :  { %1769 = vmatpush1.bf16.msra.mxu0 %v2376_v7  ;;  %1801 = vmatpush1.bf16.msra.mxu1 %v2394_v31 }
 0x264   :  { %1771 = vmatprep.subr.bf16.mxu0 %v2379_v10  ;;  %1803 = vmatprep.subr.bf16.mxu1 %v2397_v32 }
 0x267   :  { %1773 = vmatpush1.bf16.msra.mxu0 %v2388_v24  ;;  %1805 = vmatpush1.bf16.msra.mxu1 %v2404_v40 }
 0x268   :  { %1775 = vmatprep.subr.bf16.mxu0 %v2391_v27  ;;  %1807 = vmatprep.subr.bf16.mxu1 %v2407_v41 }
 0x26b   :  { %1777 = vmatpush1.bf16.msra.mxu0 %v2400_v39  ;;  %1809 = vmatpush1.bf16.msra.mxu1 %v2411_v47 }
 0x26c   :  { %1811 = vmatprep.subr.bf16.mxu0 %v2319_v4  ;;  %1843 = vmatprep.subr.bf16.mxu1 %v2332_v22 }
 0x321   :  { %v532_v49 = vpop.f32.mrb[4].mxu0  ;;  %v603_v50 = vpop.f32.mrb[4].mxu1 }
 0x322   :  { %v608_v51 = vadd.f32 %v532_v49, %v462_v35  ;;  %v534_v53 = vpop.f32.mrb[5].mxu0  ;;  %v605_v54 = vpop.f32.mrb[5].mxu1  ;;  %v610_v3 = vadd.f32 %v603_v50, %v464_v63  ;;  %v638_v35 = vld [vmem:[#allocation4 + $0x68] sm:$0xff] }
 0x323   :  { %v609_v56 = vadd.f32 %v534_v53, %v463_v44  ;;  %v611_v61 = vadd.f32 %v605_v54, %v465_v60 }
 0x324   :  { %v1536_v57 = vmul.f32 -1.442695, %v608_v51 }
 0x325   :  { %v1537_v59 = vmul.f32 -1.442695, %v609_v56  ;;  %v1538_v2 = vmul.f32 -1.442695, %v611_v61  ;;  %v639_v61 = vld [vmem:[#allocation4 + $0x70] sm:$0xff] }
 0x326   :  { %2104 = vpow2.f32 %v1536_v57 }
 0x327   :  { %2106 = vpow2.f32 %v1537_v59  ;;  %v640_v59 = vld [vmem:[#allocation4 + $0x78] sm:$0xff] }
 0x328   :  { %2108 = vpow2.f32 %v1538_v2 }
 0x329   :  { %2110 = vtanh.f32 %v610_v3 }
 0x330   :  { %v2105_v5 = vpop.eup %2104 }
 0x331   :  { %v2107_v6 = vpop.eup %2106  ;;  %v615_v11 = vadd.f32 1.0, %v2105_v5 }
 0x332   :  { %v621_v12 = vadd.f32 1.0, %v2107_v6  ;;  %v2109_v13 = vpop.eup %2108 }
 0x333   :  { %2112 = vrcp.f32 %v615_v11  ;;  %v2111_v16 = vpop.eup %2110  ;;  %v628_v23 = vadd.f32 1.0, %v2109_v13 }
 0x334   :  { %2114 = vrcp.f32 %v621_v12 }
 0x335   :  { %2116 = vrcp.f32 %v628_v23 }
 0x33d   :  { %v2113_v19 = vpop.eup %2112 }
 0x33e   :  { %v2115_v20 = vpop.eup %2114  ;;  %v632_v21 = vmul.f32 %v2113_v19, %v2111_v16 }
 0x33f   :  { %v631_v28 = vmul.f32 %v2115_v20, %v2491_v34  ;;  %v2117_v36 = vpop.eup %2116  ;;  %v637_v34 = vld [vmem:[#allocation4 + $0x60] sm:$0xff] }
 0x341   :  { %v2529_v29 = vadd.f32 %v632_v21, %v631_v28 }
 0x343   :  { %2118 = vtanh.f32 %v2529_v29 }
 0x34d   :  { %v2119_v38 = vpop.eup %2118 }
 0x34e   :  { %v635_v43 = vmul.f32 %v2119_v38, %v2117_v36 }
 0x350   :  { %706 = vmatmul.mubr.f32.vlgmr.msra.gmra.mrb[6].mxu0 %v635_v43  ;;  %777 = vmatmul.mubr.f32.vlgmr.msra.gmra.mrb[6].mxu1 %v635_v43 }
 0x351   :  { %1813 = vmatpush1.bf16.msra.mxu0 %v2321_v8  ;;  %1845 = vmatpush1.bf16.msra.mxu1 %v2334_v25 }
 0x352   :  { %1815 = vmatprep.subr.bf16.mxu0 %v2323_v9  ;;  %1847 = vmatprep.subr.bf16.mxu1 %v2344_v33 }
 0x353   :  { %880 = vmatprep.mubr.f32.mxu0 %v2276_v0  ;;  %951 = vmatprep.mubr.f32.mxu1 %v2276_v0 }
 0x355   :  { %1817 = vmatpush1.bf16.msra.mxu0 %v2327_v14  ;;  %1849 = vmatpush1.bf16.msra.mxu1 %v2346_v37 }
 0x356   :  { %1819 = vmatprep.subr.bf16.mxu0 %v2330_v17  ;;  %1851 = vmatprep.subr.bf16.mxu1 %v2352_v45 }
 0x359   :  { %1821 = vmatpush1.bf16.msra.mxu0 %v2337_v26  ;;  %1853 = vmatpush1.bf16.msra.mxu1 %v2358_v48 }
 0x35a   :  { %1823 = vmatprep.subr.bf16.mxu0 %v2341_v30  ;;  %1855 = vmatprep.subr.bf16.mxu1 %v2361_v52 }
 0x35d   :  { %1825 = vmatpush1.bf16.msra.mxu0 %v2350_v42  ;;  %1857 = vmatpush1.bf16.msra.mxu1 %v2370_v62 }
 0x35e   :  { %1827 = vmatprep.subr.bf16.mxu0 %v2355_v46  ;;  %1859 = vmatprep.subr.bf16.mxu1 %v2373_v1 }
 0x361   :  { %1829 = vmatpush1.bf16.msra.mxu0 %v2364_v55  ;;  %1861 = vmatpush1.bf16.msra.mxu1 %v2382_v15 }
 0x362   :  { %1831 = vmatprep.subr.bf16.mxu0 %v2367_v58  ;;  %1863 = vmatprep.subr.bf16.mxu1 %v2385_v18 }
 0x365   :  { %1833 = vmatpush1.bf16.msra.mxu0 %v2376_v7  ;;  %1865 = vmatpush1.bf16.msra.mxu1 %v2394_v31 }
 0x366   :  { %1835 = vmatprep.subr.bf16.mxu0 %v2379_v10  ;;  %1867 = vmatprep.subr.bf16.mxu1 %v2397_v32 }
 0x369   :  { %1837 = vmatpush1.bf16.msra.mxu0 %v2388_v24  ;;  %1869 = vmatpush1.bf16.msra.mxu1 %v2404_v40 }
 0x36a   :  { %1839 = vmatprep.subr.bf16.mxu0 %v2391_v27  ;;  %1871 = vmatprep.subr.bf16.mxu1 %v2407_v41 }
 0x36d   :  { %1841 = vmatpush1.bf16.msra.mxu0 %v2400_v39  ;;  %1873 = vmatpush1.bf16.msra.mxu1 %v2411_v47 }
 0x36e   :  { %1875 = vmatprep.subr.bf16.mxu0 %v2319_v4  ;;  %1907 = vmatprep.subr.bf16.mxu1 %v2332_v22 }
 0x423   :  { %v707_v44 = vpop.f32.mrb[6].mxu0  ;;  %v778_v49 = vpop.f32.mrb[6].mxu1 }
 0x424   :  { %v783_v50 = vadd.f32 %v707_v44, %v637_v34  ;;  %v709_v51 = vpop.f32.mrb[7].mxu0  ;;  %v780_v53 = vpop.f32.mrb[7].mxu1  ;;  %v785_v2 = vadd.f32 %v778_v49, %v639_v61  ;;  %v813_v34 = vld [vmem:[#allocation4 + $0x88] sm:$0xff] }
 0x425   :  { %v784_v54 = vadd.f32 %v709_v51, %v638_v35  ;;  %v786_v60 = vadd.f32 %v780_v53, %v640_v59 }
 0x426   :  { %v1539_v56 = vmul.f32 -1.442695, %v783_v50 }
 0x427   :  { %v1540_v57 = vmul.f32 -1.442695, %v784_v54  ;;  %v1541_v63 = vmul.f32 -1.442695, %v786_v60  ;;  %v814_v60 = vld [vmem:[#allocation4 + $0x90] sm:$0xff] }
 0x428   :  { %2120 = vpow2.f32 %v1539_v56 }
 0x429   :  { %2122 = vpow2.f32 %v1540_v57  ;;  %v815_v57 = vld [vmem:[#allocation4 + $0x98] sm:$0xff] }
 0x42a   :  { %2124 = vpow2.f32 %v1541_v63 }
 0x42b   :  { %2126 = vtanh.f32 %v785_v2 }
 0x432   :  { %v2121_v3 = vpop.eup %2120 }
 0x433   :  { %v2123_v5 = vpop.eup %2122  ;;  %v790_v6 = vadd.f32 1.0, %v2121_v3 }
 0x434   :  { %v796_v11 = vadd.f32 1.0, %v2123_v5  ;;  %v2125_v12 = vpop.eup %2124 }
 0x435   :  { %2128 = vrcp.f32 %v790_v6  ;;  %v2127_v13 = vpop.eup %2126  ;;  %v803_v21 = vadd.f32 1.0, %v2125_v12 }
 0x436   :  { %2130 = vrcp.f32 %v796_v11 }
 0x437   :  { %2132 = vrcp.f32 %v803_v21 }
 0x43f   :  { %v2129_v16 = vpop.eup %2128 }
 0x440   :  { %v2131_v19 = vpop.eup %2130  ;;  %v807_v20 = vmul.f32 %v2129_v16, %v2127_v13 }
 0x441   :  { %v806_v23 = vmul.f32 %v2131_v19, %v2529_v29  ;;  %v2133_v36 = vpop.eup %2132  ;;  %v812_v29 = vld [vmem:[#allocation4 + $0x80] sm:$0xff] }
 0x443   :  { %v2567_v28 = vadd.f32 %v807_v20, %v806_v23 }
 0x445   :  { %2134 = vtanh.f32 %v2567_v28 }
 0x44f   :  { %v2135_v38 = vpop.eup %2134 }
 0x450   :  { %v810_v43 = vmul.f32 %v2135_v38, %v2133_v36 }
 0x452   :  { %881 = vmatmul.mubr.f32.vlgmr.msra.gmra.mrb[8].mxu0 %v810_v43  ;;  %952 = vmatmul.mubr.f32.vlgmr.msra.gmra.mrb[8].mxu1 %v810_v43 }
 0x453   :  { %1877 = vmatpush1.bf16.msra.mxu0 %v2321_v8  ;;  %1909 = vmatpush1.bf16.msra.mxu1 %v2334_v25 }
 0x454   :  { %1879 = vmatprep.subr.bf16.mxu0 %v2323_v9  ;;  %1911 = vmatprep.subr.bf16.mxu1 %v2344_v33 }
 0x455   :  { %1055 = vmatprep.mubr.f32.mxu0 %v2276_v0  ;;  %1126 = vmatprep.mubr.f32.mxu1 %v2276_v0 }
 0x457   :  { %1881 = vmatpush1.bf16.msra.mxu0 %v2327_v14  ;;  %1913 = vmatpush1.bf16.msra.mxu1 %v2346_v37 }
 0x458   :  { %1883 = vmatprep.subr.bf16.mxu0 %v2330_v17  ;;  %1915 = vmatprep.subr.bf16.mxu1 %v2352_v45 }
 0x45b   :  { %1885 = vmatpush1.bf16.msra.mxu0 %v2337_v26  ;;  %1917 = vmatpush1.bf16.msra.mxu1 %v2358_v48 }
 0x45c   :  { %1887 = vmatprep.subr.bf16.mxu0 %v2341_v30  ;;  %1919 = vmatprep.subr.bf16.mxu1 %v2361_v52 }
 0x45f   :  { %1889 = vmatpush1.bf16.msra.mxu0 %v2350_v42  ;;  %1921 = vmatpush1.bf16.msra.mxu1 %v2370_v62 }
 0x460   :  { %1891 = vmatprep.subr.bf16.mxu0 %v2355_v46  ;;  %1923 = vmatprep.subr.bf16.mxu1 %v2373_v1 }
 0x463   :  { %1893 = vmatpush1.bf16.msra.mxu0 %v2364_v55  ;;  %1925 = vmatpush1.bf16.msra.mxu1 %v2382_v15 }
 0x464   :  { %1895 = vmatprep.subr.bf16.mxu0 %v2367_v58  ;;  %1927 = vmatprep.subr.bf16.mxu1 %v2385_v18 }
 0x467   :  { %1897 = vmatpush1.bf16.msra.mxu0 %v2376_v7  ;;  %1929 = vmatpush1.bf16.msra.mxu1 %v2394_v31 }
 0x468   :  { %1899 = vmatprep.subr.bf16.mxu0 %v2379_v10  ;;  %1931 = vmatprep.subr.bf16.mxu1 %v2397_v32 }
 0x46b   :  { %1901 = vmatpush1.bf16.msra.mxu0 %v2388_v24  ;;  %1933 = vmatpush1.bf16.msra.mxu1 %v2404_v40 }
 0x46c   :  { %1903 = vmatprep.subr.bf16.mxu0 %v2391_v27  ;;  %1935 = vmatprep.subr.bf16.mxu1 %v2407_v41 }
 0x46f   :  { %1905 = vmatpush1.bf16.msra.mxu0 %v2400_v39  ;;  %1937 = vmatpush1.bf16.msra.mxu1 %v2411_v47 }
 0x470   :  { %1939 = vmatprep.subr.bf16.mxu0 %v2319_v4  ;;  %1971 = vmatprep.subr.bf16.mxu1 %v2332_v22 }
 0x525   :  { %v882_v35 = vpop.f32.mrb[8].mxu0  ;;  %v953_v44 = vpop.f32.mrb[8].mxu1 }
 0x526   :  { %v958_v49 = vadd.f32 %v882_v35, %v812_v29  ;;  %v884_v50 = vpop.f32.mrb[9].mxu0  ;;  %v955_v51 = vpop.f32.mrb[9].mxu1  ;;  %v960_v63 = vadd.f32 %v953_v44, %v814_v60  ;;  %v988_v29 = vld [vmem:[#allocation4 + $0xa8] sm:$0xff] }
 0x527   :  { %v959_v53 = vadd.f32 %v884_v50, %v813_v34  ;;  %v961_v59 = vadd.f32 %v955_v51, %v815_v57 }
 0x528   :  { %v1542_v54 = vmul.f32 -1.442695, %v958_v49 }
 0x529   :  { %v1543_v56 = vmul.f32 -1.442695, %v959_v53  ;;  %v1544_v61 = vmul.f32 -1.442695, %v961_v59  ;;  %v989_v59 = vld [vmem:[#allocation4 + $0xb0] sm:$0xff] }
 0x52a   :  { %2136 = vpow2.f32 %v1542_v54 }
 0x52b   :  { %2138 = vpow2.f32 %v1543_v56  ;;  %v990_v56 = vld [vmem:[#allocation4 + $0xb8] sm:$0xff] }
 0x52c   :  { %2140 = vpow2.f32 %v1544_v61 }
 0x52d   :  { %2142 = vtanh.f32 %v960_v63 }
 0x534   :  { %v2137_v2 = vpop.eup %2136 }
 0x535   :  { %v2139_v3 = vpop.eup %2138  ;;  %v965_v5 = vadd.f32 1.0, %v2137_v2 }
 0x536   :  { %v971_v6 = vadd.f32 1.0, %v2139_v3  ;;  %v2141_v11 = vpop.eup %2140 }
 0x537   :  { %2144 = vrcp.f32 %v965_v5  ;;  %v2143_v12 = vpop.eup %2142  ;;  %v978_v20 = vadd.f32 1.0, %v2141_v11 }
 0x538   :  { %2146 = vrcp.f32 %v971_v6 }
 0x539   :  { %2148 = vrcp.f32 %v978_v20 }
 0x541   :  { %v2145_v13 = vpop.eup %2144 }
 0x542   :  { %v2147_v16 = vpop.eup %2146  ;;  %v982_v19 = vmul.f32 %v2145_v13, %v2143_v12 }
 0x543   :  { %v981_v21 = vmul.f32 %v2147_v16, %v2567_v28  ;;  %v2149_v36 = vpop.eup %2148  ;;  %v987_v28 = vld [vmem:[#allocation4 + $0xa0] sm:$0xff] }
 0x545   :  { %v2605_v23 = vadd.f32 %v982_v19, %v981_v21 }
 0x547   :  { %2150 = vtanh.f32 %v2605_v23 }
 0x551   :  { %v2151_v38 = vpop.eup %2150 }
 0x552   :  { %v985_v43 = vmul.f32 %v2151_v38, %v2149_v36 }
 0x554   :  { %1056 = vmatmul.mubr.f32.vlgmr.msra.gmra.mrb[10].mxu0 %v985_v43  ;;  %1127 = vmatmul.mubr.f32.vlgmr.msra.gmra.mrb[10].mxu1 %v985_v43 }
 0x555   :  { %1941 = vmatpush1.bf16.msra.mxu0 %v2321_v8  ;;  %1973 = vmatpush1.bf16.msra.mxu1 %v2334_v25 }
 0x556   :  { %1943 = vmatprep.subr.bf16.mxu0 %v2323_v9  ;;  %1975 = vmatprep.subr.bf16.mxu1 %v2344_v33 }
 0x557   :  { %1230 = vmatprep.mubr.f32.mxu0 %v2276_v0  ;;  %1301 = vmatprep.mubr.f32.mxu1 %v2276_v0 }
 0x559   :  { %1945 = vmatpush1.bf16.msra.mxu0 %v2327_v14  ;;  %1977 = vmatpush1.bf16.msra.mxu1 %v2346_v37 }
 0x55a   :  { %1947 = vmatprep.subr.bf16.mxu0 %v2330_v17  ;;  %1979 = vmatprep.subr.bf16.mxu1 %v2352_v45 }
 0x55d   :  { %1949 = vmatpush1.bf16.msra.mxu0 %v2337_v26  ;;  %1981 = vmatpush1.bf16.msra.mxu1 %v2358_v48 }
 0x55e   :  { %1951 = vmatprep.subr.bf16.mxu0 %v2341_v30  ;;  %1983 = vmatprep.subr.bf16.mxu1 %v2361_v52 }
 0x561   :  { %1953 = vmatpush1.bf16.msra.mxu0 %v2350_v42  ;;  %1985 = vmatpush1.bf16.msra.mxu1 %v2370_v62 }
 0x562   :  { %1955 = vmatprep.subr.bf16.mxu0 %v2355_v46  ;;  %1987 = vmatprep.subr.bf16.mxu1 %v2373_v1 }
 0x565   :  { %1957 = vmatpush1.bf16.msra.mxu0 %v2364_v55  ;;  %1989 = vmatpush1.bf16.msra.mxu1 %v2382_v15 }
 0x566   :  { %1959 = vmatprep.subr.bf16.mxu0 %v2367_v58  ;;  %1991 = vmatprep.subr.bf16.mxu1 %v2385_v18 }
 0x569   :  { %1961 = vmatpush1.bf16.msra.mxu0 %v2376_v7  ;;  %1993 = vmatpush1.bf16.msra.mxu1 %v2394_v31 }
 0x56a   :  { %1963 = vmatprep.subr.bf16.mxu0 %v2379_v10  ;;  %1995 = vmatprep.subr.bf16.mxu1 %v2397_v32 }
 0x56d   :  { %1965 = vmatpush1.bf16.msra.mxu0 %v2388_v24  ;;  %1997 = vmatpush1.bf16.msra.mxu1 %v2404_v40 }
 0x56e   :  { %1967 = vmatprep.subr.bf16.mxu0 %v2391_v27  ;;  %1999 = vmatprep.subr.bf16.mxu1 %v2407_v41 }
 0x571   :  { %1969 = vmatpush1.bf16.msra.mxu0 %v2400_v39  ;;  %2001 = vmatpush1.bf16.msra.mxu1 %v2411_v47 }
 0x572   :  { %2003 = vmatprep.subr.bf16.mxu0 %v2319_v4  ;;  %2035 = vmatprep.subr.bf16.mxu1 %v2332_v22 }
 0x627   :  { %v1057_v34 = vpop.f32.mrb[10].mxu0  ;;  %v1128_v35 = vpop.f32.mrb[10].mxu1 }
 0x628   :  { %v1133_v44 = vadd.f32 %v1057_v34, %v987_v28  ;;  %v1059_v49 = vpop.f32.mrb[11].mxu0  ;;  %v1130_v50 = vpop.f32.mrb[11].mxu1  ;;  %v1135_v61 = vadd.f32 %v1128_v35, %v989_v59 }
 0x629   :  { %v1134_v51 = vadd.f32 %v1059_v49, %v988_v29  ;;  %v1136_v57 = vadd.f32 %v1130_v50, %v990_v56  ;;  %v1340_v50 = vld [vmem:[#allocation4 + $0xf8] sm:$0xff] }
 0x62a   :  { %v1545_v53 = vmul.f32 -1.442695, %v1133_v44 }
 0x62b   :  { %v1546_v54 = vmul.f32 -1.442695, %v1134_v51  ;;  %v1547_v60 = vmul.f32 -1.442695, %v1136_v57 }
 0x62c   :  { %2152 = vpow2.f32 %v1545_v53  ;;  %v1339_v53 = vld [vmem:[#allocation4 + $0xf0] sm:$0xff] }
 0x62d   :  { %2154 = vpow2.f32 %v1546_v54 }
 0x62e   :  { %2156 = vpow2.f32 %v1547_v60 }
 0x62f   :  { %2158 = vtanh.f32 %v1135_v61 }
 0x636   :  { %v2153_v4 = vpop.eup %2152 }
 0x637   :  { %v2155_v63 = vpop.eup %2154  ;;  %v1140_v22 = vadd.f32 1.0, %v2153_v4 }
 0x638   :  { %v1146_v2 = vadd.f32 1.0, %v2155_v63  ;;  %v2157_v3 = vpop.eup %2156 }
 0x639   :  { %2160 = vrcp.f32 %v1140_v22  ;;  %v2159_v5 = vpop.eup %2158  ;;  %v1153_v13 = vadd.f32 1.0, %v2157_v3 }
 0x63a   :  { %2162 = vrcp.f32 %v1146_v2 }
 0x63b   :  { %2164 = vrcp.f32 %v1153_v13 }
 0x643   :  { %v2161_v6 = vpop.eup %2160 }
 0x644   :  { %v2163_v11 = vpop.eup %2162  ;;  %v1157_v12 = vmul.f32 %v2161_v6, %v2159_v5 }
 0x645   :  { %v1156_v16 = vmul.f32 %v2163_v11, %v2605_v23  ;;  %v2165_v20 = vpop.eup %2164  ;;  %v1338_v23 = vld [vmem:[#allocation4 + $0xe8] sm:$0xff] }
 0x647   :  { %v2643_v19 = vadd.f32 %v1157_v12, %v1156_v16 }
 0x649   :  { %2166 = vtanh.f32 %v2643_v19 }
 0x653   :  { %v2167_v21 = vpop.eup %2166 }
 0x654   :  { %v1160_v36 = vmul.f32 %v2167_v21, %v2165_v20 }
 0x656   :  { %1231 = vmatmul.mubr.f32.vlgmr.msra.gmra.mrb[12].mxu0 %v1160_v36  ;;  %1302 = vmatmul.mubr.f32.vlgmr.msra.gmra.mrb[12].mxu1 %v1160_v36 }
 0x657   :  { %2005 = vmatpush1.bf16.msra.mxu0 %v2321_v8  ;;  %2037 = vmatpush1.bf16.msra.mxu1 %v2334_v25  ;;  %v1163_v8 = vld [vmem:[#allocation4 + $0xc8] sm:$0xff] }
 0x658   :  { %2007 = vmatprep.subr.bf16.mxu0 %v2323_v9  ;;  %2039 = vmatprep.subr.bf16.mxu1 %v2344_v33 }
 0x659   :  { %1405 = vmatprep.mubr.f32.mxu0 %v2276_v0  ;;  %1476 = vmatprep.mubr.f32.mxu1 %v2276_v0  ;;  %v1162_v0 = vld [vmem:[#allocation4 + $0xc0] sm:$0xff] }
 0x65b   :  { %2009 = vmatpush1.bf16.msra.mxu0 %v2327_v14  ;;  %2041 = vmatpush1.bf16.msra.mxu1 %v2346_v37 }
 0x65c   :  { %2011 = vmatprep.subr.bf16.mxu0 %v2330_v17  ;;  %2043 = vmatprep.subr.bf16.mxu1 %v2352_v45 }
 0x65f   :  { %2013 = vmatpush1.bf16.msra.mxu0 %v2337_v26  ;;  %2045 = vmatpush1.bf16.msra.mxu1 %v2358_v48 }
 0x660   :  { %2015 = vmatprep.subr.bf16.mxu0 %v2341_v30  ;;  %2047 = vmatprep.subr.bf16.mxu1 %v2361_v52 }
 0x663   :  { %2017 = vmatpush1.bf16.msra.mxu0 %v2350_v42  ;;  %2049 = vmatpush1.bf16.msra.mxu1 %v2370_v62  ;;  %v1165_v42 = vld [vmem:[#allocation4 + $0xd8] sm:$0xff] }
 0x664   :  { %2019 = vmatprep.subr.bf16.mxu0 %v2355_v46  ;;  %2051 = vmatprep.subr.bf16.mxu1 %v2373_v1  ;;  %v1164_v46 = vld [vmem:[#allocation4 + $0xd0] sm:$0xff] }
 0x667   :  { %2021 = vmatpush1.bf16.msra.mxu0 %v2364_v55  ;;  %2053 = vmatpush1.bf16.msra.mxu1 %v2382_v15 }
 0x668   :  { %2023 = vmatprep.subr.bf16.mxu0 %v2367_v58  ;;  %2055 = vmatprep.subr.bf16.mxu1 %v2385_v18 }
 0x66b   :  { %2025 = vmatpush1.bf16.msra.mxu0 %v2376_v7  ;;  %2057 = vmatpush1.bf16.msra.mxu1 %v2394_v31 }
 0x66c   :  { %2027 = vmatprep.subr.bf16.mxu0 %v2379_v10  ;;  %2059 = vmatprep.subr.bf16.mxu1 %v2397_v32 }
 0x66f   :  { %2029 = vmatpush1.bf16.msra.mxu0 %v2388_v24  ;;  %2061 = vmatpush1.bf16.msra.mxu1 %v2404_v40 }
 0x670   :  { %2031 = vmatprep.subr.bf16.mxu0 %v2391_v27  ;;  %2063 = vmatprep.subr.bf16.mxu1 %v2407_v41 }
 0x673   :  { %2033 = vmatpush1.bf16.msra.mxu0 %v2400_v39  ;;  %2065 = vmatpush1.bf16.msra.mxu1 %v2411_v47  ;;  %v1337_v47 = vld [vmem:[#allocation4 + $0xe0] sm:$0xff] }
 0x729   :  { %v1232_v9 = vpop.f32.mrb[12].mxu0  ;;  %v1303_v14 = vpop.f32.mrb[12].mxu1 }
 0x72a   :  { %v1308_v17 = vadd.f32 %v1232_v9, %v1162_v0  ;;  %v1234_v25 = vpop.f32.mrb[13].mxu0  ;;  %v1305_v26 = vpop.f32.mrb[13].mxu1  ;;  %v1310_v52 = vadd.f32 %v1303_v14, %v1164_v46 }
 0x72b   :  { %v1309_v30 = vadd.f32 %v1234_v25, %v1163_v8  ;;  %v1311_v45 = vadd.f32 %v1305_v26, %v1165_v42 }
 0x72c   :  { %v1548_v33 = vmul.f32 -1.442695, %v1308_v17 }
 0x72d   :  { %v1549_v37 = vmul.f32 -1.442695, %v1309_v30  ;;  %v1550_v48 = vmul.f32 -1.442695, %v1311_v45 }
 0x72e   :  { %2168 = vpow2.f32 %v1548_v33 }
 0x72f   :  { %2170 = vpow2.f32 %v1549_v37 }
 0x730   :  { %2172 = vpow2.f32 %v1550_v48 }
 0x731   :  { %2174 = vtanh.f32 %v1310_v52 }
 0x738   :  { %v2169_v55 = vpop.eup %2168 }
 0x739   :  { %v2171_v58 = vpop.eup %2170  ;;  %v1315_v62 = vadd.f32 1.0, %v2169_v55 }
 0x73a   :  { %v1321_v1 = vadd.f32 1.0, %v2171_v58  ;;  %v2173_v7 = vpop.eup %2172 }
 0x73b   :  { %2176 = vrcp.f32 %v1315_v62  ;;  %v2175_v10 = vpop.eup %2174  ;;  %v1328_v27 = vadd.f32 1.0, %v2173_v7 }
 0x73c   :  { %2178 = vrcp.f32 %v1321_v1 }
 0x73d   :  { %2180 = vrcp.f32 %v1328_v27 }
 0x745   :  { %v2177_v15 = vpop.eup %2176 }
 0x746   :  { %v2179_v18 = vpop.eup %2178  ;;  %v1332_v24 = vmul.f32 %v2177_v15, %v2175_v10 }
 0x747   :  { %v1331_v31 = vmul.f32 %v2179_v18, %v2643_v19  ;;  %v2181_v39 = vpop.eup %2180 }
 0x749   :  { %v1333_v32 = vadd.f32 %v1332_v24, %v1331_v31 }
 0x74b   :  { %2182 = vtanh.f32 %v1333_v32 }
 0x755   :  { %v2183_v40 = vpop.eup %2182 }
 0x756   :  { %v1335_v41 = vmul.f32 %v2183_v40, %v2181_v39 }
 0x758   :  { %1406 = vmatmul.mubr.f32.vlgmr.msra.gmra.mrb[14].mxu0 %v1335_v41  ;;  %1477 = vmatmul.mubr.f32.vlgmr.msra.gmra.mrb[14].mxu1 %v1335_v41 }
 0x82b   :  { %v1407_v38 = vpop.f32.mrb[14].mxu0  ;;  %v1478_v43 = vpop.f32.mrb[14].mxu1 }
 0x82c   :  { %v1483_v28 = vadd.f32 %v1407_v38, %v1337_v47  ;;  %v1409_v29 = vpop.f32.mrb[15].mxu0  ;;  %v1480_v34 = vpop.f32.mrb[15].mxu1  ;;  %v1485_v56 = vadd.f32 %v1478_v43, %v1339_v53 }
 0x82d   :  { %v1484_v35 = vadd.f32 %v1409_v29, %v1338_v23  ;;  %v1486_v51 = vadd.f32 %v1480_v34, %v1340_v50 }
 0x82e   :  { %v1551_v44 = vmul.f32 -1.442695, %v1483_v28 }
 0x82f   :  { %v1552_v49 = vmul.f32 -1.442695, %v1484_v35  ;;  %v1553_v54 = vmul.f32 -1.442695, %v1486_v51 }
 0x830   :  { %2184 = vpow2.f32 %v1551_v44 }
 0x831   :  { %2186 = vpow2.f32 %v1552_v49 }
 0x832   :  { %2188 = vpow2.f32 %v1553_v54 }
 0x833   :  { %2190 = vtanh.f32 %v1485_v56 }
 0x83a   :  { %v2185_v57 = vpop.eup %2184 }
 0x83b   :  { %v2187_v59 = vpop.eup %2186  ;;  %v1490_v60 = vadd.f32 1.0, %v2185_v57 }
 0x83c   :  { %v1496_v61 = vadd.f32 1.0, %v2187_v59  ;;  %v2189_v4 = vpop.eup %2188 }
 0x83d   :  { %2192 = vrcp.f32 %v1490_v60  ;;  %v2191_v63 = vpop.eup %2190  ;;  %v1503_v5 = vadd.f32 1.0, %v2189_v4 }
 0x83e   :  { %2194 = vrcp.f32 %v1496_v61 }
 0x83f   :  { %2196 = vrcp.f32 %v1503_v5 }
 0x847   :  { %v2193_v22 = vpop.eup %2192 }
 0x848   :  { %v2195_v2 = vpop.eup %2194  ;;  %v1507_v3 = vmul.f32 %v2193_v22, %v2191_v63 }
 0x849   :  { %v1506_v6 = vmul.f32 %v2195_v2, %v1333_v32  ;;  %v2197_v12 = vpop.eup %2196 }
 0x84b   :  { %v1508_v11 = vadd.f32 %v1507_v3, %v1506_v6 }
 0x84d   :  { %2198 = vtanh.f32 %v1508_v11 }
 0x857   :  { %v2199_v13 = vpop.eup %2198 }
 0x858   :  { %v1510_v16 = vmul.f32 %v2199_v13, %v2197_v12 }
 0x85a   :  { %1513 = vst [vmem:[#allocation9] sm:$0xff] %v1510_v16 }
 0x85b   :  { %2255 = shalt.err (!%p2252_p6)
}
 0x85c   :  { %s2256_s10 = scalar_lea.hbm %s2693_s2, 128 }
 0x85d   :  { %p2257_p7 = scmp.ne.s32.totalorder %s2693_s2, %s2256_s10  ;;  %p2260_p8 = scmp.lt.u32.totalorder %s2256_s10, %s2693_s2 }
 0x85f   :  { %p2262_p9 = pnand %p2260_p8, %p2257_p7 }
 0x861   :  { %2265 = shalt.err (!%p2262_p9)
}
 0x862   :  { %1523 = dma.vmem_to_hbm [thread:$0]  %s1521_s6, 128, %s2693_s2, [#allocation6]  }
 0x863   :  { %2270 = dma.done.wait [#allocation6], 128  }
 0x864   :  { %2271 = vsyncadd [#allocation6], 4294967168 }
 0x865   :  { %1527 = vsyncpa [#allocation5], 1 }
 0x866   :  { %1528 = vsyncpa [#allocation8], 1 }
 0x867   :  { %1529 = vsyncpa [#allocation6], 1 }

</bundles_post_ra>
